<compile_context>
chip_gen: v7x
topology: tpu7x:2x2x1
jax: 0.10.0
libtpu: 0.0.40
codegen_flags: <defaults>
</compile_context>

<pallas_src>
import math
import numpy as np

import jax
import jax.numpy as jnp
from jax.experimental import pallas as pl
from jax.experimental.pallas import tpu as pltpu


NUM_CHANNELS = 19
KERNEL = 8
OUT_DIM = 2
SEQ_LEN = 256      # chosen so the flattened conv output is 25 (= lin1.in_features)


def _pad8(c):
    return ((c + 7) // 8) * 8


def _conv_cfg(num_channels=NUM_CHANNELS, kernel=KERNEL, seq_len=SEQ_LEN):
    """Static per-layer shapes for depth == 3."""
    nc = num_channels
    layer_defs = [
        (kernel,      nc,     nc,     True),    # conv1 + maxpool
        (kernel // 2, nc,     nc,     True),    # conv2 + maxpool
        (kernel // 2, nc,     2 * nc, True),    # conv3 + maxpool
        (kernel // 2, 2 * nc, 1,      False),   # conv4 (depth==3 override), no pool
    ]
    cfg = []
    L = seq_len
    for li, (K, cin, cout, pool) in enumerate(layer_defs):
        Lout = L - K + 1
        Lp = Lout // 2 if pool else Lout
        last = li == len(layer_defs) - 1
        cfg.append(dict(
            K=K, cin=cin, cout=cout,
            cin_p=_pad8(cin),
            cout_p=(cout if last else _pad8(cout)),   # conv4 keeps Cout == 1
            Lin=L, Lout=Lout, Lp=Lp, pool=pool))
        L = Lp
    return cfg


# ---------------------------------------------------------------------------
# Fused Pallas kernel
# ---------------------------------------------------------------------------

def _make_fused_kernel(cfg, batch_tile, out_dim):
    """conv1..conv4 + MLP head for one batch tile (channel-first layout)."""

    def kernel(x_ref,
               w1_ref, b1_ref, w2_ref, b2_ref, w3_ref, b3_ref, w4_ref, b4_ref,
               wl1_ref, bl1_ref, wl2_ref, bl2_ref, wl3_ref, bl3_ref,
               o_ref):
        conv_w = (w1_ref, w2_ref, w3_ref, w4_ref)
        conv_b = (b1_ref, b2_ref, b3_ref, b4_ref)

        # MaxPool1d(2) as two 0/1 "selection" matmuls. Built once per grid step
        # from 2-D iota, reused for every element of the batch tile:
        #   se[l, i] == 1 iff l == 2*i     -> y @ se picks even positions
        #   so[l, i] == 1 iff l == 2*i + 1 -> y @ so picks odd positions
        pool_mats = []
        for layer in cfg:
            if not layer["pool"]:
                pool_mats.append(None)
                continue
            Lout, Lp = layer["Lout"], layer["Lp"]
            rows = jax.lax.broadcasted_iota(jnp.int32, (Lout, Lp), 0)
            cols = jax.lax.broadcasted_iota(jnp.int32, (Lout, Lp), 1)
            se = (rows == 2 * cols).astype(jnp.float32)
            so = (rows == 2 * cols + 1).astype(jnp.float32)
            pool_mats.append((se, so))

        for b in range(batch_tile):            # static unroll; batch_tile is small
            h = x_ref[b]                       # (Cin_pad, Lin): channels on sublanes
            for li, layer in enumerate(cfg):
                K, Lout = layer["K"], layer["Lout"]
                # im2col: sublane-aligned concat (Cin_pad % 8 == 0) of the K
                # shifted views, then ONE MXU matmul for the whole layer.
                patches = jnp.concatenate(
                    [h[:, k:k + Lout] for k in range(K)], axis=0)
                y = jnp.dot(conv_w[li][...], patches,
                            preferred_element_type=jnp.float32) + conv_b[li][...]
                y = jnp.maximum(y, 0.0)                          # ReLU
                if layer["pool"]:
                    se, so = pool_mats[li]
                    y = jnp.maximum(                             # MaxPool1d(2)
                        jnp.dot(y, se, preferred_element_type=jnp.float32),
                        jnp.dot(y, so, preferred_element_type=jnp.float32))
                h = y

            # conv4 has a single (unpadded) output channel, so h is (1, 25): this
            # is exactly torch's conv_out.reshape(B, -1) row for this element.
            z = jnp.maximum(
                jnp.dot(h, wl1_ref[...], preferred_element_type=jnp.float32)
                + bl1_ref[...], 0.0)
            z = jnp.maximum(
                jnp.dot(z, wl2_ref[...], preferred_element_type=jnp.float32)
                + bl2_ref[...], 0.0)
            z = (jnp.dot(z, wl3_ref[...], preferred_element_type=jnp.float32)
                 + bl3_ref[...])
            o_ref[0, pl.ds(b, 1), :] = z       # (1, out_dim) row of the only output

    return kernel


def _pick_batch_tile(B):
    # Each element's fused working set is tiny; the tile mostly amortizes the
    # ~0.35us/step grid overhead. Keep >= 2 grid steps when possible so the
    # "parallel" batch axis can be sharded over v7x's two TensorCores.
    for tb in (8, 4, 2):
        if B % tb == 0 and B // tb >= 2:
            return tb
    return 1


def cnn_ns_forward(kparams, x_ncl, *, batch_tile=None):
    """Fused forward. x_ncl: (B, C, L) float32, PyTorch NCW layout."""
    cfg = _conv_cfg()
    B, C, L = x_ncl.shape
    assert C == cfg[0]["cin"] and L == cfg[0]["Lin"]
    cin_p = cfg[0]["cin_p"]
    out_dim = kparams["lin3_w"].shape[1]

    tb = _pick_batch_tile(B) if batch_tile is None else batch_tile
    assert B % tb == 0
    num_tiles = B // tb

    # Zero-pad channels to a sublane multiple once at the edge. Padded channels
    # stay exactly zero through every layer and contribute nothing.
    x_pad = jnp.pad(x_ncl.astype(jnp.float32), ((0, 0), (0, cin_p - C), (0, 0)))

    weights = [
        kparams["conv1_w"], kparams["conv1_b"],
        kparams["conv2_w"], kparams["conv2_b"],
        kparams["conv3_w"], kparams["conv3_b"],
        kparams["conv4_w"], kparams["conv4_b"],
        kparams["lin1_w"], kparams["lin1_b"],
        kparams["lin2_w"], kparams["lin2_b"],
        kparams["lin3_w"], kparams["lin3_b"],
    ]
    # Whole-array blocks with constant index maps: DMA'd into VMEM once and
    # revisited for every grid step.
    weight_specs = [
        pl.BlockSpec(w.shape, lambda i, nd=w.ndim: (0,) * nd) for w in weights
    ]

    kernel = _make_fused_kernel(cfg, tb, out_dim)
    # NOTE: per-step working set (inputs + weights + temporaries) is ~2 MiB, so
    # the default scoped-VMEM limit is ample on v5e/v6e/v7x alike.
    out = pl.pallas_call(
        kernel,
        out_shape=jax.ShapeDtypeStruct((num_tiles, tb, out_dim), jnp.float32),
        grid_spec=pltpu.PrefetchScalarGridSpec(
            num_scalar_prefetch=0,
            grid=(num_tiles,),
            in_specs=[pl.BlockSpec((tb, cin_p, L), lambda i: (i, 0, 0))]
                     + weight_specs,
            out_specs=pl.BlockSpec((1, tb, out_dim), lambda i: (i, 0, 0)),
        ),
        compiler_params=pltpu.CompilerParams(
            dimension_semantics=("parallel",)),
    )(x_pad, *weights)
    return out.reshape(B, out_dim)


# ---------------------------------------------------------------------------
# Parameter init (xavier_uniform weights) and kernel-layout preparation
# ---------------------------------------------------------------------------

def _xavier_uniform(key, shape, fan_in, fan_out):
    bound = math.sqrt(6.0 / (fan_in + fan_out))
    return jax.random.uniform(key, shape, jnp.float32, -bound, bound)


def init_params(key, num_channels=NUM_CHANNELS, kernel=KERNEL, out_dim=OUT_DIM):
    """PyTorch-layout parameters.

    NOTE: the PyTorch module zero-inits biases; we use small random biases here
    so the self-test actually exercises the bias-add paths of the kernel.
    """
    nc = num_channels
    conv_defs = [
        ("conv1", nc, nc, kernel),
        ("conv2", nc, nc, kernel // 2),
        ("conv3", 2 * nc, nc, kernel // 2),
        ("conv4", 1, 2 * nc, kernel // 2),     # depth == 3 override
    ]
    lin_defs = [
        ("lin1", 8, 25),                       # depth==3, kernel==8 -> (25, 8)
        ("lin2", 4, 8),
        ("lin3", out_dim, 4),
    ]
    keys = jax.random.split(key, 2 * (len(conv_defs) + len(lin_defs)))
    tp = {}
    ki = 0
    for name, cout, cin, k in conv_defs:                  # torch conv weight (Cout, Cin, K)
        tp[name + "_w"] = _xavier_uniform(keys[ki], (cout, cin, k), cin * k, cout * k)
        tp[name + "_b"] = 0.1 * jax.random.normal(keys[ki + 1], (cout,), jnp.float32)
        ki += 2
    for name, dout, din in lin_defs:                      # torch linear weight (out, in)
        tp[name + "_w"] = _xavier_uniform(keys[ki], (dout, din), din, dout)
        tp[name + "_b"] = 0.1 * jax.random.normal(keys[ki + 1], (dout,), jnp.float32)
        ki += 2
    return tp


def prep_kernel_params(torch_params):
    """Kernel-friendly layouts:
      conv:   (Cout, Cin, K) -> flattened/zero-padded im2col weight
              (Cout_pad, K*Cin_pad) with entry [co, k*Cin_pad + ci] = w[co, ci, k],
              bias -> (Cout_pad, 1) column.
      linear: weight -> (in, out), bias -> (1, out).
    """
    cfg = _conv_cfg()
    kp = {}
    for li, name in enumerate(["conv1", "conv2", "conv3", "conv4"]):
        lc = cfg[li]
        w = torch_params[name + "_w"]                   # (Cout, Cin, K)
        b = torch_params[name + "_b"]                   # (Cout,)
        w_kc = jnp.transpose(w, (0, 2, 1))              # (Cout, K, Cin)
        w_kc = jnp.pad(w_kc, ((0, lc["cout_p"] - lc["cout"]),
                              (0, 0),
                              (0, lc["cin_p"] - lc["cin"])))
        kp[name + "_w"] = w_kc.reshape(lc["cout_p"], lc["K"] * lc["cin_p"])
        kp[name + "_b"] = jnp.pad(b, (0, lc["cout_p"] - lc["cout"])).reshape(
            lc["cout_p"], 1)
    for name in ["lin1", "lin2", "lin3"]:
        kp[name + "_w"] = torch_params[name + "_w"].T
        kp[name + "_b"] = torch_params[name + "_b"][None, :]
    return kp


# ---------------------------------------------------------------------------
# Pure-JAX reference (correctness check only)
# ---------------------------------------------------------------------------

def ref_forward(tp, x):
    relu = lambda v: jnp.maximum(v, 0.0)

    def conv(h, w, b):
        y = jax.lax.conv_general_dilated(
            h, w, (1,), "VALID", dimension_numbers=("NCH", "OIH", "NCH"))
        return y + b[None, :, None]

    def pool(y):
        B, C, L = y.shape
        Lp = L // 2
        return y[..., : 2 * Lp].reshape(B, C, Lp, 2).max(-1)

    h = pool(relu(conv(x, tp["conv1_w"], tp["conv1_b"])))
    h = pool(relu(conv(h, tp["conv2_w"], tp["conv2_b"])))
    h = pool(relu(conv(h, tp["conv3_w"], tp["conv3_b"])))
    h = relu(conv(h, tp["conv4_w"], tp["conv4_b"]))
    flat = h.reshape(x.shape[0], -1)
    h = relu(flat @ tp["lin1_w"].T + tp["lin1_b"])
    h = relu(h @ tp["lin2_w"].T + tp["lin2_b"])
    return h @ tp["lin3_w"].T + tp["lin3_b"]


# ---------------------------------------------------------------------------

if __name__ == "__main__":
    key = jax.random.PRNGKey(0)
    pkey, xkey = jax.random.split(key)

    torch_params = init_params(pkey)
    kparams = prep_kernel_params(torch_params)

    # Input: batch=2, channels=19, length=256 (length chosen so the flattened
    # conv output matches lin1's in_features=25 for depth=3 / kernel=8).
    x = jax.random.normal(xkey, (2, NUM_CHANNELS, SEQ_LEN), jnp.float32)

    out = jax.block_until_ready(cnn_ns_forward(kparams, x))
    ref = jax.block_until_ready(ref_forward(torch_params, x))
    np.testing.assert_allclose(np.asarray(out), np.asarray(ref),
                               rtol=1e-3, atol=1e-3)

    print("KERNEL_OK")
</pallas_src>

<mosaic_0001>
module attributes {stable_mosaic.version = 11 : i64} {
  func.func @kernel(%arg0: i32, %arg1: memref<1x24x256xf32, #tpu.memory_space<vmem>>, %arg2: memref<24x192xf32, #tpu.memory_space<vmem>>, %arg3: memref<24x1xf32, #tpu.memory_space<vmem>>, %arg4: memref<24x96xf32, #tpu.memory_space<vmem>>, %arg5: memref<24x1xf32, #tpu.memory_space<vmem>>, %arg6: memref<40x96xf32, #tpu.memory_space<vmem>>, %arg7: memref<40x1xf32, #tpu.memory_space<vmem>>, %arg8: memref<1x160xf32, #tpu.memory_space<vmem>>, %arg9: memref<1x1xf32, #tpu.memory_space<vmem>>, %arg10: memref<25x8xf32, #tpu.memory_space<vmem>>, %arg11: memref<1x8xf32, #tpu.memory_space<vmem>>, %arg12: memref<8x4xf32, #tpu.memory_space<vmem>>, %arg13: memref<1x4xf32, #tpu.memory_space<vmem>>, %arg14: memref<4x2xf32, #tpu.memory_space<vmem>>, %arg15: memref<1x2xf32, #tpu.memory_space<vmem>>, %arg16: memref<1x1x2xf32, #tpu.memory_space<vmem>>) attributes {dimension_semantics = [#tpu.dimension_semantics<parallel>], iteration_bounds = array<i64: 2>, scalar_prefetch = 0 : i64, scratch_operands = 0 : i64, tpu.core_type = #tpu.core_type<tc>, window_params = [{transform_indices = @transform_0, window_bounds = array<i64: 1, 24, 256>}, {pipeline_mode = #tpu.pipeline_mode<synchronous>, transform_indices = @transform_1, window_bounds = array<i64: 24, 192>}, {pipeline_mode = #tpu.pipeline_mode<synchronous>, transform_indices = @transform_2, window_bounds = array<i64: 24, 1>}, {pipeline_mode = #tpu.pipeline_mode<synchronous>, transform_indices = @transform_3, window_bounds = array<i64: 24, 96>}, {pipeline_mode = #tpu.pipeline_mode<synchronous>, transform_indices = @transform_4, window_bounds = array<i64: 24, 1>}, {pipeline_mode = #tpu.pipeline_mode<synchronous>, transform_indices = @transform_5, window_bounds = array<i64: 40, 96>}, {pipeline_mode = #tpu.pipeline_mode<synchronous>, transform_indices = @transform_6, window_bounds = array<i64: 40, 1>}, {pipeline_mode = #tpu.pipeline_mode<synchronous>, transform_indices = @transform_7, window_bounds = array<i64: 1, 160>}, {pipeline_mode = #tpu.pipeline_mode<synchronous>, transform_indices = @transform_8, window_bounds = array<i64: 1, 1>}, {pipeline_mode = #tpu.pipeline_mode<synchronous>, transform_indices = @transform_9, window_bounds = array<i64: 25, 8>}, {pipeline_mode = #tpu.pipeline_mode<synchronous>, transform_indices = @transform_10, window_bounds = array<i64: 1, 8>}, {pipeline_mode = #tpu.pipeline_mode<synchronous>, transform_indices = @transform_11, window_bounds = array<i64: 8, 4>}, {pipeline_mode = #tpu.pipeline_mode<synchronous>, transform_indices = @transform_12, window_bounds = array<i64: 1, 4>}, {pipeline_mode = #tpu.pipeline_mode<synchronous>, transform_indices = @transform_13, window_bounds = array<i64: 4, 2>}, {pipeline_mode = #tpu.pipeline_mode<synchronous>, transform_indices = @transform_14, window_bounds = array<i64: 1, 2>}, {transform_indices = @transform_15, window_bounds = array<i64: 1, 1, 2>}]} {
    %0 = tpu.iota {dimensions = array<i32: 0>} : vector<249x124xi32>
    %1 = tpu.iota {dimensions = array<i32: 1>} : vector<249x124xi32>
    %c2_i32 = arith.constant 2 : i32
    %2 = vector.broadcast %c2_i32 : i32 to vector<249x124xi32>
    %3 = arith.muli %2, %1 : vector<249x124xi32>
    %4 = arith.cmpi eq, %0, %3 : vector<249x124xi32>
    %5 = arith.extui %4 : vector<249x124xi1> to vector<249x124xi32>
    %6 = arith.sitofp %5 : vector<249x124xi32> to vector<249x124xf32>
    %c2_i32_0 = arith.constant 2 : i32
    %7 = vector.broadcast %c2_i32_0 : i32 to vector<249x124xi32>
    %8 = arith.muli %7, %1 : vector<249x124xi32>
    %c1_i32 = arith.constant 1 : i32
    %9 = vector.broadcast %c1_i32 : i32 to vector<249x124xi32>
    %10 = arith.addi %8, %9 : vector<249x124xi32>
    %11 = arith.cmpi eq, %0, %10 : vector<249x124xi32>
    %12 = arith.extui %11 : vector<249x124xi1> to vector<249x124xi32>
    %13 = arith.sitofp %12 : vector<249x124xi32> to vector<249x124xf32>
    %14 = tpu.iota {dimensions = array<i32: 0>} : vector<121x60xi32>
    %15 = tpu.iota {dimensions = array<i32: 1>} : vector<121x60xi32>
    %c2_i32_1 = arith.constant 2 : i32
    %16 = vector.broadcast %c2_i32_1 : i32 to vector<121x60xi32>
    %17 = arith.muli %16, %15 : vector<121x60xi32>
    %18 = arith.cmpi eq, %14, %17 : vector<121x60xi32>
    %19 = arith.extui %18 : vector<121x60xi1> to vector<121x60xi32>
    %20 = arith.sitofp %19 : vector<121x60xi32> to vector<121x60xf32>
    %c2_i32_2 = arith.constant 2 : i32
    %21 = vector.broadcast %c2_i32_2 : i32 to vector<121x60xi32>
    %22 = arith.muli %21, %15 : vector<121x60xi32>
    %c1_i32_3 = arith.constant 1 : i32
    %23 = vector.broadcast %c1_i32_3 : i32 to vector<121x60xi32>
    %24 = arith.addi %22, %23 : vector<121x60xi32>
    %25 = arith.cmpi eq, %14, %24 : vector<121x60xi32>
    %26 = arith.extui %25 : vector<121x60xi1> to vector<121x60xi32>
    %27 = arith.sitofp %26 : vector<121x60xi32> to vector<121x60xf32>
    %28 = tpu.iota {dimensions = array<i32: 0>} : vector<57x28xi32>
    %29 = tpu.iota {dimensions = array<i32: 1>} : vector<57x28xi32>
    %c2_i32_4 = arith.constant 2 : i32
    %30 = vector.broadcast %c2_i32_4 : i32 to vector<57x28xi32>
    %31 = arith.muli %30, %29 : vector<57x28xi32>
    %32 = arith.cmpi eq, %28, %31 : vector<57x28xi32>
    %33 = arith.extui %32 : vector<57x28xi1> to vector<57x28xi32>
    %34 = arith.sitofp %33 : vector<57x28xi32> to vector<57x28xf32>
    %c2_i32_5 = arith.constant 2 : i32
    %35 = vector.broadcast %c2_i32_5 : i32 to vector<57x28xi32>
    %36 = arith.muli %35, %29 : vector<57x28xi32>
    %c1_i32_6 = arith.constant 1 : i32
    %37 = vector.broadcast %c1_i32_6 : i32 to vector<57x28xi32>
    %38 = arith.addi %36, %37 : vector<57x28xi32>
    %39 = arith.cmpi eq, %28, %38 : vector<57x28xi32>
    %40 = arith.extui %39 : vector<57x28xi1> to vector<57x28xi32>
    %41 = arith.sitofp %40 : vector<57x28xi32> to vector<57x28xf32>
    %c0 = arith.constant 0 : index
    %c0_7 = arith.constant 0 : index
    %c0_8 = arith.constant 0 : index
    %42 = vector.load %arg1[%c0, %c0_7, %c0_8] : memref<1x24x256xf32, #tpu.memory_space<vmem>>, vector<1x24x256xf32>
    %43 = vector.shape_cast %42 : vector<1x24x256xf32> to vector<24x256xf32>
    %44 = vector.extract_strided_slice %43 {offsets = [0, 0], sizes = [24, 249], strides = [1, 1]} : vector<24x256xf32> to vector<24x249xf32>
    %45 = vector.extract_strided_slice %43 {offsets = [0, 1], sizes = [24, 249], strides = [1, 1]} : vector<24x256xf32> to vector<24x249xf32>
    %46 = vector.extract_strided_slice %43 {offsets = [0, 2], sizes = [24, 249], strides = [1, 1]} : vector<24x256xf32> to vector<24x249xf32>
    %47 = vector.extract_strided_slice %43 {offsets = [0, 3], sizes = [24, 249], strides = [1, 1]} : vector<24x256xf32> to vector<24x249xf32>
    %48 = vector.extract_strided_slice %43 {offsets = [0, 4], sizes = [24, 249], strides = [1, 1]} : vector<24x256xf32> to vector<24x249xf32>
    %49 = vector.extract_strided_slice %43 {offsets = [0, 5], sizes = [24, 249], strides = [1, 1]} : vector<24x256xf32> to vector<24x249xf32>
    %50 = vector.extract_strided_slice %43 {offsets = [0, 6], sizes = [24, 249], strides = [1, 1]} : vector<24x256xf32> to vector<24x249xf32>
    %51 = vector.extract_strided_slice %43 {offsets = [0, 7], sizes = [24, 249], strides = [1, 1]} : vector<24x256xf32> to vector<24x249xf32>
    %52 = tpu.concatenate %44, %45, %46, %47, %48, %49, %50, %51 in 0 : vector<24x249xf32>, vector<24x249xf32>, vector<24x249xf32>, vector<24x249xf32>, vector<24x249xf32>, vector<24x249xf32>, vector<24x249xf32>, vector<24x249xf32> -> vector<192x249xf32>
    %c0_9 = arith.constant 0 : index
    %c0_10 = arith.constant 0 : index
    %53 = vector.load %arg2[%c0_9, %c0_10] : memref<24x192xf32, #tpu.memory_space<vmem>>, vector<24x192xf32>
    %cst = arith.constant dense<0.000000e+00> : vector<24x249xf32>
    %54 = tpu.matmul %53, %52, %cst {dimension_numbers = #tpu.dot_dimension_numbers<[1], [0], [0], [1], [0, 0, 1, 1], [], []>} : vector<24x192xf32>, vector<192x249xf32>, vector<24x249xf32> -> vector<24x249xf32>
    %c0_11 = arith.constant 0 : index
    %c0_12 = arith.constant 0 : index
    %55 = vector.load %arg3[%c0_11, %c0_12] : memref<24x1xf32, #tpu.memory_space<vmem>>, vector<24x1xf32>
    %56 = vector.broadcast %55 : vector<24x1xf32> to vector<24x249xf32>
    %57 = arith.addf %54, %56 : vector<24x249xf32>
    %cst_13 = arith.constant 0.000000e+00 : f32
    %58 = vector.broadcast %cst_13 : f32 to vector<24x249xf32>
    %59 = arith.maximumf %57, %58 : vector<24x249xf32>
    %cst_14 = arith.constant dense<0.000000e+00> : vector<24x124xf32>
    %60 = tpu.matmul %59, %6, %cst_14 {dimension_numbers = #tpu.dot_dimension_numbers<[1], [0], [0], [1], [0, 0, 1, 1], [], []>} : vector<24x249xf32>, vector<249x124xf32>, vector<24x124xf32> -> vector<24x124xf32>
    %cst_15 = arith.constant dense<0.000000e+00> : vector<24x124xf32>
    %61 = tpu.matmul %59, %13, %cst_15 {dimension_numbers = #tpu.dot_dimension_numbers<[1], [0], [0], [1], [0, 0, 1, 1], [], []>} : vector<24x249xf32>, vector<249x124xf32>, vector<24x124xf32> -> vector<24x124xf32>
    %62 = arith.maximumf %60, %61 : vector<24x124xf32>
    %63 = vector.extract_strided_slice %62 {offsets = [0, 0], sizes = [24, 121], strides = [1, 1]} : vector<24x124xf32> to vector<24x121xf32>
    %64 = vector.extract_strided_slice %62 {offsets = [0, 1], sizes = [24, 121], strides = [1, 1]} : vector<24x124xf32> to vector<24x121xf32>
    %65 = vector.extract_strided_slice %62 {offsets = [0, 2], sizes = [24, 121], strides = [1, 1]} : vector<24x124xf32> to vector<24x121xf32>
    %66 = vector.extract_strided_slice %62 {offsets = [0, 3], sizes = [24, 121], strides = [1, 1]} : vector<24x124xf32> to vector<24x121xf32>
    %67 = tpu.concatenate %63, %64, %65, %66 in 0 : vector<24x121xf32>, vector<24x121xf32>, vector<24x121xf32>, vector<24x121xf32> -> vector<96x121xf32>
    %c0_16 = arith.constant 0 : index
    %c0_17 = arith.constant 0 : index
    %68 = vector.load %arg4[%c0_16, %c0_17] : memref<24x96xf32, #tpu.memory_space<vmem>>, vector<24x96xf32>
    %cst_18 = arith.constant dense<0.000000e+00> : vector<24x121xf32>
    %69 = tpu.matmul %68, %67, %cst_18 {dimension_numbers = #tpu.dot_dimension_numbers<[1], [0], [0], [1], [0, 0, 1, 1], [], []>} : vector<24x96xf32>, vector<96x121xf32>, vector<24x121xf32> -> vector<24x121xf32>
    %c0_19 = arith.constant 0 : index
    %c0_20 = arith.constant 0 : index
    %70 = vector.load %arg5[%c0_19, %c0_20] : memref<24x1xf32, #tpu.memory_space<vmem>>, vector<24x1xf32>
    %71 = vector.broadcast %70 : vector<24x1xf32> to vector<24x121xf32>
    %72 = arith.addf %69, %71 : vector<24x121xf32>
    %cst_21 = arith.constant 0.000000e+00 : f32
    %73 = vector.broadcast %cst_21 : f32 to vector<24x121xf32>
    %74 = arith.maximumf %72, %73 : vector<24x121xf32>
    %cst_22 = arith.constant dense<0.000000e+00> : vector<24x60xf32>
    %75 = tpu.matmul %74, %20, %cst_22 {dimension_numbers = #tpu.dot_dimension_numbers<[1], [0], [0], [1], [0, 0, 1, 1], [], []>} : vector<24x121xf32>, vector<121x60xf32>, vector<24x60xf32> -> vector<24x60xf32>
    %cst_23 = arith.constant dense<0.000000e+00> : vector<24x60xf32>
    %76 = tpu.matmul %74, %27, %cst_23 {dimension_numbers = #tpu.dot_dimension_numbers<[1], [0], [0], [1], [0, 0, 1, 1], [], []>} : vector<24x121xf32>, vector<121x60xf32>, vector<24x60xf32> -> vector<24x60xf32>
    %77 = arith.maximumf %75, %76 : vector<24x60xf32>
    %78 = vector.extract_strided_slice %77 {offsets = [0, 0], sizes = [24, 57], strides = [1, 1]} : vector<24x60xf32> to vector<24x57xf32>
    %79 = vector.extract_strided_slice %77 {offsets = [0, 1], sizes = [24, 57], strides = [1, 1]} : vector<24x60xf32> to vector<24x57xf32>
    %80 = vector.extract_strided_slice %77 {offsets = [0, 2], sizes = [24, 57], strides = [1, 1]} : vector<24x60xf32> to vector<24x57xf32>
    %81 = vector.extract_strided_slice %77 {offsets = [0, 3], sizes = [24, 57], strides = [1, 1]} : vector<24x60xf32> to vector<24x57xf32>
    %82 = tpu.concatenate %78, %79, %80, %81 in 0 : vector<24x57xf32>, vector<24x57xf32>, vector<24x57xf32>, vector<24x57xf32> -> vector<96x57xf32>
    %c0_24 = arith.constant 0 : index
    %c0_25 = arith.constant 0 : index
    %83 = vector.load %arg6[%c0_24, %c0_25] : memref<40x96xf32, #tpu.memory_space<vmem>>, vector<40x96xf32>
    %cst_26 = arith.constant dense<0.000000e+00> : vector<40x57xf32>
    %84 = tpu.matmul %83, %82, %cst_26 {dimension_numbers = #tpu.dot_dimension_numbers<[1], [0], [0], [1], [0, 0, 1, 1], [], []>} : vector<40x96xf32>, vector<96x57xf32>, vector<40x57xf32> -> vector<40x57xf32>
    %c0_27 = arith.constant 0 : index
    %c0_28 = arith.constant 0 : index
    %85 = vector.load %arg7[%c0_27, %c0_28] : memref<40x1xf32, #tpu.memory_space<vmem>>, vector<40x1xf32>
    %86 = vector.broadcast %85 : vector<40x1xf32> to vector<40x57xf32>
    %87 = arith.addf %84, %86 : vector<40x57xf32>
    %cst_29 = arith.constant 0.000000e+00 : f32
    %88 = vector.broadcast %cst_29 : f32 to vector<40x57xf32>
    %89 = arith.maximumf %87, %88 : vector<40x57xf32>
    %cst_30 = arith.constant dense<0.000000e+00> : vector<40x28xf32>
    %90 = tpu.matmul %89, %34, %cst_30 {dimension_numbers = #tpu.dot_dimension_numbers<[1], [0], [0], [1], [0, 0, 1, 1], [], []>} : vector<40x57xf32>, vector<57x28xf32>, vector<40x28xf32> -> vector<40x28xf32>
    %cst_31 = arith.constant dense<0.000000e+00> : vector<40x28xf32>
    %91 = tpu.matmul %89, %41, %cst_31 {dimension_numbers = #tpu.dot_dimension_numbers<[1], [0], [0], [1], [0, 0, 1, 1], [], []>} : vector<40x57xf32>, vector<57x28xf32>, vector<40x28xf32> -> vector<40x28xf32>
    %92 = arith.maximumf %90, %91 : vector<40x28xf32>
    %93 = vector.extract_strided_slice %92 {offsets = [0, 0], sizes = [40, 25], strides = [1, 1]} : vector<40x28xf32> to vector<40x25xf32>
    %94 = vector.extract_strided_slice %92 {offsets = [0, 1], sizes = [40, 25], strides = [1, 1]} : vector<40x28xf32> to vector<40x25xf32>
    %95 = vector.extract_strided_slice %92 {offsets = [0, 2], sizes = [40, 25], strides = [1, 1]} : vector<40x28xf32> to vector<40x25xf32>
    %96 = vector.extract_strided_slice %92 {offsets = [0, 3], sizes = [40, 25], strides = [1, 1]} : vector<40x28xf32> to vector<40x25xf32>
    %97 = tpu.concatenate %93, %94, %95, %96 in 0 : vector<40x25xf32>, vector<40x25xf32>, vector<40x25xf32>, vector<40x25xf32> -> vector<160x25xf32>
    %c0_32 = arith.constant 0 : index
    %c0_33 = arith.constant 0 : index
    %98 = vector.load %arg8[%c0_32, %c0_33] : memref<1x160xf32, #tpu.memory_space<vmem>>, vector<1x160xf32>
    %cst_34 = arith.constant dense<0.000000e+00> : vector<1x25xf32>
    %99 = tpu.matmul %98, %97, %cst_34 {dimension_numbers = #tpu.dot_dimension_numbers<[1], [0], [0], [1], [0, 0, 1, 1], [], []>} : vector<1x160xf32>, vector<160x25xf32>, vector<1x25xf32> -> vector<1x25xf32>
    %c0_35 = arith.constant 0 : index
    %c0_36 = arith.constant 0 : index
    %100 = vector.load %arg9[%c0_35, %c0_36] : memref<1x1xf32, #tpu.memory_space<vmem>>, vector<1x1xf32>
    %101 = vector.broadcast %100 : vector<1x1xf32> to vector<1x25xf32>
    %102 = arith.addf %99, %101 : vector<1x25xf32>
    %cst_37 = arith.constant 0.000000e+00 : f32
    %103 = vector.broadcast %cst_37 : f32 to vector<1x25xf32>
    %104 = arith.maximumf %102, %103 : vector<1x25xf32>
    %c0_38 = arith.constant 0 : index
    %c0_39 = arith.constant 0 : index
    %105 = vector.load %arg10[%c0_38, %c0_39] : memref<25x8xf32, #tpu.memory_space<vmem>>, vector<25x8xf32>
    %cst_40 = arith.constant dense<0.000000e+00> : vector<1x8xf32>
    %106 = tpu.matmul %104, %105, %cst_40 {dimension_numbers = #tpu.dot_dimension_numbers<[1], [0], [0], [1], [0, 0, 1, 1], [], []>} : vector<1x25xf32>, vector<25x8xf32>, vector<1x8xf32> -> vector<1x8xf32>
    %c0_41 = arith.constant 0 : index
    %c0_42 = arith.constant 0 : index
    %107 = vector.load %arg11[%c0_41, %c0_42] : memref<1x8xf32, #tpu.memory_space<vmem>>, vector<1x8xf32>
    %108 = arith.addf %106, %107 : vector<1x8xf32>
    %cst_43 = arith.constant 0.000000e+00 : f32
    %109 = vector.broadcast %cst_43 : f32 to vector<1x8xf32>
    %110 = arith.maximumf %108, %109 : vector<1x8xf32>
    %c0_44 = arith.constant 0 : index
    %c0_45 = arith.constant 0 : index
    %111 = vector.load %arg12[%c0_44, %c0_45] : memref<8x4xf32, #tpu.memory_space<vmem>>, vector<8x4xf32>
    %cst_46 = arith.constant dense<0.000000e+00> : vector<1x4xf32>
    %112 = tpu.matmul %110, %111, %cst_46 {dimension_numbers = #tpu.dot_dimension_numbers<[1], [0], [0], [1], [0, 0, 1, 1], [], []>} : vector<1x8xf32>, vector<8x4xf32>, vector<1x4xf32> -> vector<1x4xf32>
    %c0_47 = arith.constant 0 : index
    %c0_48 = arith.constant 0 : index
    %113 = vector.load %arg13[%c0_47, %c0_48] : memref<1x4xf32, #tpu.memory_space<vmem>>, vector<1x4xf32>
    %114 = arith.addf %112, %113 : vector<1x4xf32>
    %cst_49 = arith.constant 0.000000e+00 : f32
    %115 = vector.broadcast %cst_49 : f32 to vector<1x4xf32>
    %116 = arith.maximumf %114, %115 : vector<1x4xf32>
    %c0_50 = arith.constant 0 : index
    %c0_51 = arith.constant 0 : index
    %117 = vector.load %arg14[%c0_50, %c0_51] : memref<4x2xf32, #tpu.memory_space<vmem>>, vector<4x2xf32>
    %cst_52 = arith.constant dense<0.000000e+00> : vector<1x2xf32>
    %118 = tpu.matmul %116, %117, %cst_52 {dimension_numbers = #tpu.dot_dimension_numbers<[1], [0], [0], [1], [0, 0, 1, 1], [], []>} : vector<1x4xf32>, vector<4x2xf32>, vector<1x2xf32> -> vector<1x2xf32>
    %c0_53 = arith.constant 0 : index
    %c0_54 = arith.constant 0 : index
    %119 = vector.load %arg15[%c0_53, %c0_54] : memref<1x2xf32, #tpu.memory_space<vmem>>, vector<1x2xf32>
    %120 = arith.addf %118, %119 : vector<1x2xf32>
    %c0_55 = arith.constant 0 : index
    %c0_56 = arith.constant 0 : index
    %c0_57 = arith.constant 0 : index
    %121 = vector.load %arg16[%c0_55, %c0_56, %c0_57] : memref<1x1x2xf32, #tpu.memory_space<vmem>>, vector<1x1x2xf32>
    %122 = vector.shape_cast %121 : vector<1x1x2xf32> to vector<1x2xf32>
    %123 = vector.shape_cast %120 : vector<1x2xf32> to vector<1x1x2xf32>
    tpu.vector_store %arg16[%c0_55, %c0_56, %c0_57], %123 {strides = array<i32>} : memref<1x1x2xf32, #tpu.memory_space<vmem>>, vector<1x1x2xf32>,
    return
  }
  func.func @transform_0(%arg0: i32) -> (i32, i32, i32) {
    %c0_i32 = arith.constant 0 : i32
    %c0_i32_0 = arith.constant 0 : i32
    %c0_i32_1 = arith.constant 0 : i32
    return %arg0, %c0_i32, %c0_i32_0 : i32, i32, i32
  }
  func.func @transform_1(%arg0: i32) -> (i32, i32) {
    %c0_i32 = arith.constant 0 : i32
    %c0_i32_0 = arith.constant 0 : i32
    %c0_i32_1 = arith.constant 0 : i32
    return %c0_i32, %c0_i32_0 : i32, i32
  }
  func.func @transform_2(%arg0: i32) -> (i32, i32) {
    %c0_i32 = arith.constant 0 : i32
    %c0_i32_0 = arith.constant 0 : i32
    %c0_i32_1 = arith.constant 0 : i32
    return %c0_i32, %c0_i32_0 : i32, i32
  }
  func.func @transform_3(%arg0: i32) -> (i32, i32) {
    %c0_i32 = arith.constant 0 : i32
    %c0_i32_0 = arith.constant 0 : i32
    %c0_i32_1 = arith.constant 0 : i32
    return %c0_i32, %c0_i32_0 : i32, i32
  }
  func.func @transform_4(%arg0: i32) -> (i32, i32) {
    %c0_i32 = arith.constant 0 : i32
    %c0_i32_0 = arith.constant 0 : i32
    %c0_i32_1 = arith.constant 0 : i32
    return %c0_i32, %c0_i32_0 : i32, i32
  }
  func.func @transform_5(%arg0: i32) -> (i32, i32) {
    %c0_i32 = arith.constant 0 : i32
    %c0_i32_0 = arith.constant 0 : i32
    %c0_i32_1 = arith.constant 0 : i32
    return %c0_i32, %c0_i32_0 : i32, i32
  }
  func.func @transform_6(%arg0: i32) -> (i32, i32) {
    %c0_i32 = arith.constant 0 : i32
    %c0_i32_0 = arith.constant 0 : i32
    %c0_i32_1 = arith.constant 0 : i32
    return %c0_i32, %c0_i32_0 : i32, i32
  }
  func.func @transform_7(%arg0: i32) -> (i32, i32) {
    %c0_i32 = arith.constant 0 : i32
    %c0_i32_0 = arith.constant 0 : i32
    %c0_i32_1 = arith.constant 0 : i32
    return %c0_i32, %c0_i32_0 : i32, i32
  }
  func.func @transform_8(%arg0: i32) -> (i32, i32) {
    %c0_i32 = arith.constant 0 : i32
    %c0_i32_0 = arith.constant 0 : i32
    %c0_i32_1 = arith.constant 0 : i32
    return %c0_i32, %c0_i32_0 : i32, i32
  }
  func.func @transform_9(%arg0: i32) -> (i32, i32) {
    %c0_i32 = arith.constant 0 : i32
    %c0_i32_0 = arith.constant 0 : i32
    %c0_i32_1 = arith.constant 0 : i32
    return %c0_i32, %c0_i32_0 : i32, i32
  }
  func.func @transform_10(%arg0: i32) -> (i32, i32) {
    %c0_i32 = arith.constant 0 : i32
    %c0_i32_0 = arith.constant 0 : i32
    %c0_i32_1 = arith.constant 0 : i32
    return %c0_i32, %c0_i32_0 : i32, i32
  }
  func.func @transform_11(%arg0: i32) -> (i32, i32) {
    %c0_i32 = arith.constant 0 : i32
    %c0_i32_0 = arith.constant 0 : i32
    %c0_i32_1 = arith.constant 0 : i32
    return %c0_i32, %c0_i32_0 : i32, i32
  }
  func.func @transform_12(%arg0: i32) -> (i32, i32) {
    %c0_i32 = arith.constant 0 : i32
    %c0_i32_0 = arith.constant 0 : i32
    %c0_i32_1 = arith.constant 0 : i32
    return %c0_i32, %c0_i32_0 : i32, i32
  }
  func.func @transform_13(%arg0: i32) -> (i32, i32) {
    %c0_i32 = arith.constant 0 : i32
    %c0_i32_0 = arith.constant 0 : i32
    %c0_i32_1 = arith.constant 0 : i32
    return %c0_i32, %c0_i32_0 : i32, i32
  }
  func.func @transform_14(%arg0: i32) -> (i32, i32) {
    %c0_i32 = arith.constant 0 : i32
    %c0_i32_0 = arith.constant 0 : i32
    %c0_i32_1 = arith.constant 0 : i32
    return %c0_i32, %c0_i32_0 : i32, i32
  }
  func.func @transform_15(%arg0: i32) -> (i32, i32, i32) {
    %c0_i32 = arith.constant 0 : i32
    %c0_i32_0 = arith.constant 0 : i32
    %c0_i32_1 = arith.constant 0 : i32
    return %arg0, %c0_i32, %c0_i32_0 : i32, i32, i32
  }
}

</mosaic_0001>

<bundles_post_ra>
// kernel: tpu_custom_call.1
= control target key start
LH: loop header
LB: loop body
LE: loop exit
PB: predicated region body
PF: predicated region fallthrough
CT: control target
= control target key end

     0   :  { %s4737_s0 = inlined_call_operand.vmem [shape: f32[2,24,256], index: 0, kind: input, shape index: {}]   ;;  %s4738_s1 = inlined_call_operand.vmem [shape: f32[24,192], index: 1, kind: input, shape index: {}]   ;;  %s4739_s2 = inlined_call_operand.vmem [shape: f32[24,1], index: 2, kind: input, shape index: {}]   ;;  %s4740_s3 = inlined_call_operand.hbm [shape: f32[24,96], index: 3, kind: input, shape index: {}]   ;;  %s4741_s4 = inlined_call_operand.vmem [shape: f32[24,1], index: 4, kind: input, shape index: {}]   ;;  %s4742_s5 = inlined_call_operand.hbm [shape: f32[40,96], index: 5, kind: input, shape index: {}]   ;;  %s4743_s6 = inlined_call_operand.vmem [shape: f32[40,1], index: 6, kind: input, shape index: {}]   ;;  %s4744_s7 = inlined_call_operand.vmem [shape: f32[1,160], index: 7, kind: input, shape index: {}]   ;;  %s4745_s8 = inlined_call_operand.<no memory space> [shape: f32[1,1], index: 8, kind: input, shape index: {}]   ;;  %s4746_s9 = inlined_call_operand.vmem [shape: f32[25,8], index: 9, kind: input, shape index: {}]   ;;  %s4747_s10 = inlined_call_operand.vmem [shape: f32[1,8], index: 10, kind: input, shape index: {}]   ;;  %s4748_s11 = inlined_call_operand.vmem [shape: f32[8,4], index: 11, kind: input, shape index: {}]   ;;  %s4749_s12 = inlined_call_operand.vmem [shape: f32[1,4], index: 12, kind: input, shape index: {}]   ;;  %s4750_s13 = inlined_call_operand.vmem [shape: f32[4,2], index: 13, kind: input, shape index: {}]   ;;  %s4751_s14 = inlined_call_operand.vmem [shape: f32[1,2], index: 14, kind: input, shape index: {}]   ;;  %s4752_s15 = inlined_call_operand.hbm [shape: f32[2,1,2], index: 15, kind: output, shape index: {}]  }
   0x1   :  { %4780 = sst [smem:[#allocation18_spill]] %s4751_s14  ;;  %v20_v0 = vstv %s4745_s8 }
   0x2   :  { %4781 = sst [smem:[#allocation19_spill]] %s4752_s15  ;;  %21 = vst [vmem:[#allocation2] sm:$0x1] %v20_v0 }
   0x3   :  { %22 = vsyncpa [#allocation4], 0 }
   0x4   :  { %23 = vsyncpa [#allocation7], 0 }
   0x5   :  { %24 = vsyncpa [#allocation5], 0 }
   0x6   :  { %26 = vsyncpa [#allocation5 + $0x1], 0  ;;  %s3790_s20 = smov 0   ;;  %s3792_s21 = smov 0  }
   0x7   :  { %s3794_s22 = smov 0   ;;  %s3796_s23 = smov 0  }
   0x8 LB: > { %4782 = sst [smem:[#allocation12_spill]] %s3674_s20  ;;  %s3811_s8 = sadd.s32 4294967295, %s3686_s23   ;;  %s3686_s23 = sphi %s3796_s23, %s4863_s23   ;;  %s3682_s22 = sphi %s3794_s22, %s4865_s22   ;;  %s3678_s21 = sphi %s3792_s21, %s4867_s21   ;;  %s3674_s20 = sphi %s3790_s20, %s4866_s20  }
   0x9   : > { %4783 = sst [smem:[#allocation13_spill]] %s3682_s22  ;;  %s2402_s24 = sadd.s32 4294967294, %s3686_s23  }
   0xa   : > { %4784 = sst [smem:[#allocation14_spill]] %s3686_s23  ;;  %s3815_s25 = sadd.s32 1, %s3686_s23  }
   0xb   : > { %4785 = sst [smem:[#allocation15_spill]] %s3815_s25  ;;  %s359_s26 = sadd.s32 1, %s3682_s22 }
   0xc   : > { %s356_s27 = ssub.s32 %s3686_s23, %s3815_s25  ;;  %p369_p0 = scmp.ne.s32.totalorder %s3682_s22, %s3678_s21 }
   0xd   : > { %p357_p1 = scmp.eq.s32.totalorder %s356_s27, 0  ;;  %p370_p2 = scmp.eq.s32.totalorder %s3811_s8, 1 }
   0xe   : > { %p375_p3 = scmp.ne.s32.totalorder %s3678_s21, %s3674_s20  ;;  %p376_p4 = scmp.eq.s32.totalorder %s2402_s24, 1 }
   0xf   : > { %s3826_s28 = scalar_select %p357_p1, %s3682_s22, %s359_s26  }
  0x10   : > { %p3828_p5 = por %p370_p2, %p369_p0  ;;  %p3832_p6 = por %p376_p4, %p375_p3 }
  0x11   : > { %4786 = sst [smem:[#allocation16_spill]] %s3826_s28  ;;  %p2403_p7 = scmp.ge.s32.totalorder %s3686_s23, 1 }
  0x12   : > { %s4787_s29 = scalar_select %p3828_p5, 1, 0 }
  0x13   : > { %s4788_s30 = scalar_select %p3832_p6, 1, 0 }
  0x14   : > { %p383_p8 = scmp.lt.s32.totalorder %s3686_s23, 3  ;;  %p4758_p9 = scmp.eq.s32.totalorder %s3811_s8, 0 }
  0x15   : > { %4789 = sst [smem:[#allocation17_spill]] %s4788_s30  ;;  %s3688_s17 = smov [#allocation3]  }
  0x16   : > { %p3839_p10 = pnand %p2403_p7, %p383_p8  ;;  %s401_s18 = sshll.u32 %s3688_s17, 4  ;;  %s402_s18 = int_to_ptr.vmem [resolvable:$true] %s401_s18 }
  0x17   : > { %s3689_s24 = smov [#allocation6]   ;;  %s3560_s22 = scalar_lea.hbm %s4740_s3, 384 }
  0x18   : > { %s4790_s16 = scalar_select %p3839_p10, 1, 0 }
  0x19   : > { %p3327_p11 = pneg %p3839_p10  ;;  %s417_s26 = sshll.u32 %s3689_s24, 4  ;;  %s3851_s26 = int_to_ptr.vmem [resolvable:$true] %s417_s26 }
  0x1a   : > { %p3561_p13 = scmp.ne.s32.totalorder %s4740_s3, %s3560_s22  ;;  %p3567_p3 = scmp.lt.u32.totalorder %s3560_s22, %s4740_s3 }
  0x1b   : > { %p3847_p12 = pnand %p4758_p9, %p3327_p11 }
  0x1d   : > { %p3562_p0 = pneg %p3847_p12 }
  0x1f   : > { %p3563_p1 = pnand %p3562_p0, %p3561_p13 }
  0x21   : > { %p3564_p2 = pneg %p3563_p1 }
  0x23   : > { %p3569_p4 = pnand %p3567_p3, %p3564_p2 }
  0x25   : > { %3572 = shalt.err (!%p3569_p4)
}
  0x26   : > { %s3573_s24 = scalar_lea.vmem %s402_s18, 384  ;;  %p3581_p9 = scmp.lt.s32.totalorder %s402_s18, %s402_s18 }
  0x27   : > { %p3574_p7 = scmp.ne.s32.totalorder %s402_s18, %s3573_s24  ;;  %p3582_p6 = scmp.lt.s32.totalorder %s3573_s24, %s3573_s24 }
  0x29   : > { %p3576_p8 = pnand %p3574_p7, %p3562_p0  ;;  %p3583_p5 = por %p3582_p6, %p3581_p9 }
  0x2b   : > { %p3577_p11 = pneg %p3576_p8 }
  0x2d   : > { %p3584_p10 = pnand %p3583_p5, %p3577_p11 }
  0x2f   : > { %3587 = shalt.err (!%p3584_p10)
}
  0x30   : > { %s3690_s25 = smov 128   ;;  %s3691_s28 = smov 8  }
  0x31   : > { %3330 = dma.hbm_to_vmem [thread:$0]  (!%p3847_p12), %s4740_s3, 384, %s402_s18, [#allocation4], %s3690_s25, %s3690_s25, %s3691_s28  }
  0x32   : > { %s3588_s17 = scalar_lea.hbm %s4742_s5, 640 }
  0x33   : > { %p3589_p13 = scmp.ne.s32.totalorder %s4742_s5, %s3588_s17  ;;  %p3595_p9 = scmp.lt.u32.totalorder %s3588_s17, %s4742_s5 }
  0x35   : > { %p3591_p5 = pnand %p3589_p13, %p3562_p0 }
  0x37   : > { %p3592_p6 = pneg %p3591_p5 }
  0x39   : > { %p3597_p10 = pnand %p3595_p9, %p3592_p6 }
  0x3b   : > { %3600 = shalt.err (!%p3597_p10)
}
  0x3c   : > { %s3601_s18 = scalar_lea.vmem %s3851_s26, 640  ;;  %p3609_p4 = scmp.lt.s32.totalorder %s3851_s26, %s3851_s26 }
  0x3d   : > { %p3602_p1 = scmp.ne.s32.totalorder %s3851_s26, %s3601_s18  ;;  %p3610_p7 = scmp.lt.s32.totalorder %s3601_s18, %s3601_s18 }
  0x3f   : > { %p3604_p2 = pnand %p3602_p1, %p3562_p0  ;;  %p3611_p8 = por %p3610_p7, %p3609_p4 }
  0x41   : > { %p3605_p3 = pneg %p3604_p2 }
  0x43   : > { %p3612_p11 = pnand %p3611_p8, %p3605_p3 }
  0x45   : > { %3615 = shalt.err (!%p3612_p11)
}
  0x46   : > { %3333 = dma.hbm_to_vmem [thread:$0]  (!%p3847_p12), %s4742_s5, 640, %s3851_s26, [#allocation7], %s3690_s25, %s3690_s25, %s3691_s28  }
  0x47   : > { %p4792_p13 = scmp.ne.s32.totalorder %s4790_s16, 0 }
  0x48   : > { %p4793_p5 = scmp.eq.s32.totalorder (!%p4792_p13), %s3811_s8, 0 }
  0x49   : > { %468 = sbr.rel (%p4792_p13) target bundleno = 2929 (0xb71), region = 80 }
  0x50   : > { %3661 = dma.done.wait (%p4793_p5), [#allocation4], 384   ;;  %p4794_p0 = pmov %p4793_p5 }
  0x52   : > { %3663 = vsyncadd (%p4794_p0), [#allocation4], 4294966912  ;;  %p4795_p6 = pmov %p4794_p0 }
  0x53   : > { %p4796_p9 = pmov %p4794_p0 }
  0x54   : > { %3665 = dma.done.wait (%p4795_p6), [#allocation7], 640  }
  0x55   : > { %3667 = vsyncadd (%p4796_p9), [#allocation7], 4294966656  ;;  %p519_p10 = scmp.lt.s32.totalorder %s3811_s8, 1  ;;  %s3692_s28 = smov 127   ;;  %v920_v12 = vld [vmem:[%s4738_s1 + $0x8] sm:$0xff]  ;;  %vm943_vm0 = vcmask 523264   ;;  %v524_v15 = vlaneseq }
  0x56   : > { %s3693_s20 = smov 126   ;;  %s3694_s22 = smov 125   ;;  %2475 = vmatprep.mubr.msk.f32.mxu0 %vm943_vm0, %v920_v12  ;;  %v925_v13 = vld [vmem:[%s4739_s2] sm:$0xff]  ;;  %v926_v14 = vld [vmem:[%s4739_s2 + $0x8] sm:$0xff]  ;;  %v3699_v16 = vmov 0   ;;  %v927_v19 = vld [vmem:[%s4739_s2 + $0x10] sm:$0xff] }
  0x57   : > { %s520_s23 = scalar_select %p519_p10, %s3811_s8, 1  ;;  %3498 = vset.pattern.permute.xlu1 %v3699_v16  ;;  %3499 = vset.pattern.permute.xlu0 %v3699_v16  ;;  %v3940_v17 = vshrl.u32 %v524_v15, 7  ;;  %v558_v18 = vand.u32 127, %v524_v15  ;;  %v3700_v28 = vmov 1.0|1.0   ;;  %v4805_v51 = vmov 0 }
  0x58   : > { %s3695_s30 = smov 124   ;;  %s3696_s27 = smov 123   ;;  %v4807_v54 = vmov 0  ;;  %v4809_v55 = vmov 0 }
  0x59   : > { %s3316_s19 = smul.u32 48, %s520_s23  ;;  %s3697_s17 = smov 122   ;;  %v3946_v20 = vadd.s32 128, %v3940_v17  ;;  %v3949_v21 = vadd.s32 136, %v3940_v17  ;;  %v3951_v22 = vmul.u32 2, %v558_v18  ;;  %v3954_v23 = vadd.s32 8, %v3940_v17 }
  0x5a   : > { %s3698_s14 = smov 121   ;;  %v3957_v24 = vadd.s32 144, %v3940_v17  ;;  %v3960_v25 = vadd.s32 152, %v3940_v17  ;;  %v3963_v26 = vadd.s32 16, %v3940_v17  ;;  %v3966_v27 = vadd.s32 24, %v3940_v17  ;;  %s517_s18 = sand.u32 1, %s3678_s21  }
  0x5b   : > { %s523_s25 = scalar_lea.vmem %s4737_s0, %s3316_s19  ;;  %vm576_vm1 = vcmp.eq.s32.totalorder %v3946_v20, %v3951_v22  ;;  %vm577_vm2 = vcmp.eq.s32.totalorder %v3949_v21, %v3951_v22  ;;  %vm560_vm3 = vcmp.eq.s32.totalorder %v3940_v17, %v3951_v22  ;;  %vm561_vm4 = vcmp.eq.s32.totalorder %v3954_v23, %v3951_v22  ;;  %s4856_s15 = sld [smem:[#allocation18_spill]] }
  0x5c   : > { %v753_v1 = vld [vmem:[%s523_s25] sm:$0xff]  ;;  %v754_v2 = vld [vmem:[%s523_s25 + $0x8] sm:$0xff]  ;;  %v755_v6 = vld [vmem:[%s523_s25 + $0x10] sm:$0xff]  ;;  %vm578_vm6 = vcmp.eq.s32.totalorder %v3957_v24, %v3951_v22  ;;  %vm579_vm7 = vcmp.eq.s32.totalorder %v3960_v25, %v3951_v22  ;;  %vm562_vm8 = vcmp.eq.s32.totalorder %v3963_v26, %v3951_v22  ;;  %vm563_vm9 = vcmp.eq.s32.totalorder %v3966_v27, %v3951_v22  ;;  %s2626_s23 = sshll.u32 %s3811_s8, 4  ;;  %s518_s19 = scalar_lea.vmem [#allocation8], %s517_s18 }
  0x5d   : > { %v3915_v3 = vld [vmem:[%s523_s25 + $0x20] sm:$0xff]  ;;  %v3393_v4 = vpack.i.bf16 %v754_v2, %v753_v1  ;;  %v3917_v5 = vld [vmem:[%s523_s25 + $0x28] sm:$0xff]  ;;  %v756_v7 = vld [vmem:[%s523_s25 + $0x18] sm:$0xff]  ;;  %v3055_v11 = vpack.c.bf16 %v755_v6, %v753_v1  ;;  %v3990_v30 = vadd.s32 160, %v3940_v17  ;;  %v3993_v31 = vadd.s32 168, %v3940_v17  ;;  %s2325_s26 = sshll.u32 %s518_s19, 4  ;;  %s4697_s26 = int_to_ptr.vmem [resolvable:$true] %s2325_s26 }
  0x5e   : > { %v3403_v8 = vpack.i.bf16 %v3917_v5, %v3915_v3  ;;  %v3398_v9 = vpack.i.bf16 %v756_v7, %v755_v6  ;;  %v3053_v10 = vpack.c.bf16 %v756_v7, %v754_v2  ;;  %vm3101_vm5 = vmpackc.low %vm577_vm2, %vm576_vm1  ;;  %v3996_v32 = vadd.s32 32, %v3940_v17  ;;  %s4857_s25 = sld [smem:[#allocation19_spill]]  ;;  %p4858_p1 = scmp.ne.s32.totalorder %s4787_s29, 0 }
  0x5f   : > { %3394 = vrot.lane.b32.xlu0 %v3393_v4, %s3692_s28  ;;  %3102 = vmatprep.subr.msk.bf16.mxu1 %vm3101_vm5, %v3700_v28  ;;  %vm3985_vm10 = vmpackc.low %vm561_vm4, %vm560_vm3  ;;  %v3999_v33 = vadd.s32 40, %v3940_v17  ;;  %v4005_v34 = vadd.s32 176, %v3940_v17  ;;  %v4008_v35 = vadd.s32 184, %v3940_v17  ;;  %vm580_vm13 = vcmp.eq.s32.totalorder %v3990_v30, %v3951_v22  ;;  %s3706_s8 = smov [#allocation8]  }
  0x60   : > { %3404 = vrot.lane.b32.xlu1 %v3403_v8, %s3692_s28  ;;  %3054 = vmatprep.subr.bf16.mxu0 %v3053_v10  ;;  %vm3105_vm11 = vmpackc.low %vm579_vm7, %vm578_vm6  ;;  %vm581_vm14 = vcmp.eq.s32.totalorder %v3993_v31, %v3951_v22  ;;  %vm564_vm1 = vcmp.eq.s32.totalorder %v3996_v32, %v3951_v22  ;;  %v4024_v37 = vadd.s32 48, %v3940_v17  ;;  %v4027_v38 = vadd.s32 56, %v3940_v17  ;;  %s3620_s24 = sshll.u32 %s3706_s8, 4  ;;  %s3621_s24 = int_to_ptr.vmem [resolvable:$false] %s3620_s24 }
  0x61   : > { %3056 = vmatpush1.bf16.msra.mxu0 %v3055_v11  ;;  %3104 = vmatpush3.bf16.msk.msra.mxu1 %vm3985_vm10, %v3700_v28  ;;  %vm4011_vm12 = vmpackc.low %vm563_vm9, %vm562_vm8  ;;  %vm565_vm2 = vcmp.eq.s32.totalorder %v3999_v33, %v3951_v22  ;;  %vm582_vm3 = vcmp.eq.s32.totalorder %v4005_v34, %v3951_v22  ;;  %vm583_vm4 = vcmp.eq.s32.totalorder %v4008_v35, %v3951_v22  ;;  %v4034_v39 = vadd.s32 192, %v3940_v17  ;;  %p3623_p4 = scmp.lt.s32.totalorder %s4697_s26, %s3621_s24 }
  0x62   : > { %3106 = vmatprep.subr.msk.bf16.mxu1 %vm3105_vm11, %v3700_v28  ;;  %vm3109_vm15 = vmpackc.low %vm581_vm14, %vm580_vm13  ;;  %v4037_v40 = vadd.s32 200, %v3940_v17  ;;  %vm4763_vm7 = vcmp.eq.s32.totalorder %v4024_v37, %v3951_v22  ;;  %vm4764_vm8 = vcmp.eq.s32.totalorder %v4027_v38, %v3951_v22  ;;  %v4052_v42 = vadd.s32 64, %v3940_v17 }
  0x63   : > { %3399 = vrot.lane.b32.xlu0 %v3398_v9, %s3692_s28  ;;  %vm4043_vm5 = vmpackc.low %vm565_vm2, %vm564_vm1  ;;  %v4055_v43 = vadd.s32 72, %v3940_v17  ;;  %vm584_vm9 = vcmp.eq.s32.totalorder %v4034_v39, %v3951_v22  ;;  %v4062_v44 = vadd.s32 208, %v3940_v17  ;;  %v4065_v45 = vadd.s32 216, %v3940_v17 }
  0x64   : > { %3409 = vrot.lane.b32.xlu1 %v3393_v4, %s3693_s20  ;;  %vm3113_vm6 = vmpackc.low %vm583_vm4, %vm582_vm3  ;;  %vm585_vm11 = vcmp.eq.s32.totalorder %v4037_v40, %v3951_v22  ;;  %v4086_v47 = vadd.s32 80, %v3940_v17  ;;  %v4089_v48 = vadd.s32 88, %v3940_v17  ;;  %v4096_v49 = vadd.s32 224, %v3940_v17 }
  0x65   : > { %3108 = vmatpush3.bf16.msk.msra.mxu1 %vm4011_vm12, %v3700_v28  ;;  %vm4077_vm13 = vmpackc.low %vm4764_vm8, %vm4763_vm7  ;;  %vm569_vm1 = vcmp.eq.s32.totalorder %v4055_v43, %v3951_v22  ;;  %vm586_vm2 = vcmp.eq.s32.totalorder %v4062_v44, %v3951_v22  ;;  %vm587_vm3 = vcmp.eq.s32.totalorder %v4065_v45, %v3951_v22  ;;  %v4099_v50 = vadd.s32 232, %v3940_v17 }
  0x66   : > { %3110 = vmatprep.subr.msk.bf16.mxu1 %vm3109_vm15, %v3700_v28  ;;  %vm3117_vm14 = vmpackc.low %vm585_vm11, %vm584_vm9  ;;  %vm568_vm15 = vcmp.eq.s32.totalorder %v4052_v42, %v3951_v22  ;;  %vm570_vm9 = vcmp.eq.s32.totalorder %v4086_v47, %v3951_v22  ;;  %vm571_vm11 = vcmp.eq.s32.totalorder %v4089_v48, %v3951_v22  ;;  %v4114_v52 = vadd.s32 96, %v3940_v17 }
  0x67   : > { %3414 = vrot.lane.b32.xlu0 %v3398_v9, %s3693_s20  ;;  %vm4105_vm4 = vmpackc.low %vm569_vm1, %vm568_vm15  ;;  %v4117_v53 = vadd.s32 104, %v3940_v17  ;;  %vm589_vm15 = vcmp.eq.s32.totalorder %v4099_v50, %v3951_v22 }
  0x68   : > { %3419 = vrot.lane.b32.xlu1 %v3403_v8, %s3693_s20  ;;  %v4806_v51 = vsel %vm4105_vm4, 4294967295, %v4805_v51  ;;  %vm4127_vm1 = vmpackc.low %vm571_vm11, %vm570_vm9  ;;  %vm821_vm9 = vcmask 1022976   ;;  %vm843_vm11 = vcmask 1014784  }
  0x69   : > { %3112 = vmatpush3.bf16.msk.msra.mxu1 %vm4043_vm5, %v3700_v28  ;;  %v4808_v54 = vsel %vm4127_vm1, 4294967295, %v4807_v54  ;;  %vm573_vm7 = vcmp.eq.s32.totalorder %v4117_v53, %v3951_v22 }
  0x6a   : > { %3114 = vmatprep.subr.msk.bf16.mxu1 %vm3113_vm6, %v3700_v28  ;;  %vm3121_vm6 = vmpackc.low %vm587_vm3, %vm586_vm2  ;;  %vm572_vm3 = vcmp.eq.s32.totalorder %v4114_v52, %v3951_v22 }
  0x6b   : > { %3424 = vrot.lane.b32.xlu0 %v3393_v4, %s3694_s22  ;;  %vm4139_vm8 = vmpackc.low %vm573_vm7, %vm572_vm3  ;;  %vm799_vm7 = vcmask 1031168   ;;  %vm4767_vm3 = vcmask 1040384  }
  0x6c   : > { %3429 = vrot.lane.b32.xlu1 %v3398_v9, %s3694_s22  ;;  %v4810_v55 = vsel %vm4139_vm8, 4294967295, %v4809_v55 }
  0x6d   : > { %3116 = vmatpush3.bf16.msk.msra.mxu1 %vm4077_vm13, %v3700_v28 }
  0x6e   : > { %3118 = vmatprep.subr.msk.bf16.mxu1 %vm3117_vm14, %v3700_v28  ;;  %vm588_vm14 = vcmp.eq.s32.totalorder %v4096_v49, %v3951_v22 }
  0x6f   : > { %3434 = vrot.lane.b32.xlu0 %v3403_v8, %s3694_s22  ;;  %vm3125_vm2 = vmpackc.low %vm589_vm15, %vm588_vm14  ;;  %vm865_vm14 = vcmask 1006592   ;;  %vm887_vm15 = vcmask 998400  }
  0x70   : > { %3439 = vrot.lane.b32.xlu1 %v3393_v4, %s3695_s30 }
  0x71   : > { %3120 = vmatpush3.bf16.msk.msra.mxu1 %vm4105_vm4, %v3700_v28 }
  0x72   : > { %3122 = vmatprep.subr.msk.bf16.mxu1 %vm3121_vm6, %v3700_v28  ;;  %vm777_vm6 = vcmask 1039360  }
  0x73   : > { %3444 = vrot.lane.b32.xlu0 %v3398_v9, %s3695_s30 }
  0x74   : > { %3449 = vrot.lane.b32.xlu1 %v3403_v8, %s3695_s30  ;;  %s4695_s30 = scalar_lea.hbm %s4857_s25, %s2626_s23 }
  0x75   : > { %3124 = vmatpush3.bf16.msk.msra.mxu1 %vm4127_vm1, %v3700_v28 }
  0x76   : > { %3126 = vmatprep.subr.msk.bf16.mxu1 %vm3125_vm2, %v3700_v28  ;;  %vm4774_vm2 = vcmask 990208  }
  0x77   : > { %3454 = vrot.lane.b32.xlu0 %v3393_v4, %s3696_s27 }
  0x78   : > { %3459 = vrot.lane.b32.xlu1 %v3398_v9, %s3696_s27 }
  0x79   : > { %3128 = vmatpush3.bf16.msk.msra.mxu1 %vm4139_vm8, %v3700_v28 }
  0x7b   : > { %3464 = vrot.lane.b32.xlu0 %v3403_v8, %s3696_s27  ;;  %s2313_s27 = scalar_lea.sflag [#allocation5], %s517_s18 }
  0x7c   : > { %3469 = vrot.lane.b32.xlu1 %v3393_v4, %s3697_s17 }
  0x7f   : > { %3474 = vrot.lane.b32.xlu0 %v3398_v9, %s3697_s17 }
  0x80   : > { %3479 = vrot.lane.b32.xlu1 %v3403_v8, %s3697_s17  ;;  %s3616_s17 = scalar_lea.vmem %s4697_s26, 16 }
  0x81   : > { %p3617_p12 = scmp.ne.s32.totalorder %s4697_s26, %s3616_s17 }
  0x83   : > { %3484 = vrot.lane.b32.xlu0 %v3393_v4, %s3698_s14  ;;  %p3618_p2 = pnand %p3617_p12, %p4858_p1 }
  0x84   : > { %3489 = vrot.lane.b32.xlu1 %v3398_v9, %s3698_s14 }
  0x85   : > { %p3619_p3 = pneg %p3618_p2 }
  0x87   : > { %3494 = vrot.lane.b32.xlu0 %v3403_v8, %s3698_s14 }
  0x88   : > { %930 = vperm.xlu1 %3498, %v925_v13  }
  0x8b   : > { %935 = vperm.xlu0 %3499, %v926_v14  }
  0x8c   : > { %940 = vperm.xlu1 %3498, %v927_v19  }
  0xd1   : > { %v3395_v56 = vpop.permute.xlu0 %3394 }
  0xd2   : > { %v3397_v57 = vunpack.i.h.bf16 %v3395_v56  ;;  %v3396_v58 = vunpack.i.l.bf16 %v3395_v56  ;;  %v3405_v59 = vpop.permute.xlu1 %3404 }
  0xd3   : > { %v3407_v60 = vunpack.i.h.bf16 %v3405_v59  ;;  %v3406_v61 = vunpack.i.l.bf16 %v3405_v59 }
  0xd4   : > { %v3057_v62 = vpack.c.bf16 %v3397_v57, %v3917_v5  ;;  %v778_v63 = vsel %vm777_vm6, %v3396_v58, %v3397_v57 }
  0xd5   : > { %v3400_v0 = vpop.permute.xlu0 %3399  ;;  %v3059_v1 = vpack.c.bf16 %v778_v63, %v3915_v3  ;;  %v780_v7 = vsel %vm777_vm6, %v3406_v61, %v3407_v60 }
  0xd6   : > { %v3402_v2 = vunpack.i.h.bf16 %v3400_v0  ;;  %v3401_v4 = vunpack.i.l.bf16 %v3400_v0  ;;  %3058 = vmatprep.subr.bf16.mxu0 %v3057_v62  ;;  %v3410_v6 = vpop.permute.xlu1 %3409 }
  0xd7   : > { %3060 = vmatpush1.bf16.msra.mxu0 %v3059_v1  ;;  %v3412_v8 = vunpack.i.h.bf16 %v3410_v6  ;;  %v3411_v9 = vunpack.i.l.bf16 %v3410_v6 }
  0xd8   : > { %v3061_v10 = vpack.c.bf16 %v3407_v60, %v3402_v2  ;;  %v779_v11 = vsel %vm777_vm6, %v3401_v4, %v3402_v2 }
  0xd9   : > { %v3415_v12 = vpop.permute.xlu0 %3414  ;;  %v3063_v5 = vpack.c.bf16 %v780_v7, %v779_v11  ;;  %v800_v3 = vsel %vm799_vm7, %v3411_v9, %v3412_v8 }
  0xda   : > { %v3417_v13 = vunpack.i.h.bf16 %v3415_v12  ;;  %v3416_v14 = vunpack.i.l.bf16 %v3415_v12  ;;  %3062 = vmatprep.subr.bf16.mxu0 %v3061_v10  ;;  %v3420_v15 = vpop.permute.xlu1 %3419 }
  0xdb   : > { %3064 = vmatpush1.bf16.msra.mxu0 %v3063_v5  ;;  %v3422_v16 = vunpack.i.h.bf16 %v3420_v15  ;;  %v3421_v18 = vunpack.i.l.bf16 %v3420_v15 }
  0xdc   : > { %v3065_v19 = vpack.c.bf16 %v3417_v13, %v3412_v8  ;;  %v801_v56 = vsel %vm799_vm7, %v3416_v14, %v3417_v13 }
  0xdd   : > { %v3425_v57 = vpop.permute.xlu0 %3424  ;;  %v3067_v58 = vpack.c.bf16 %v801_v56, %v800_v3  ;;  %v802_v62 = vsel %vm799_vm7, %v3421_v18, %v3422_v16 }
  0xde   : > { %v3427_v59 = vunpack.i.h.bf16 %v3425_v57  ;;  %v3426_v60 = vunpack.i.l.bf16 %v3425_v57  ;;  %3066 = vmatprep.subr.bf16.mxu0 %v3065_v19  ;;  %v3430_v61 = vpop.permute.xlu1 %3429 }
  0xdf   : > { %3068 = vmatpush1.bf16.msra.mxu0 %v3067_v58  ;;  %v3432_v63 = vunpack.i.h.bf16 %v3430_v61  ;;  %v3431_v0 = vunpack.i.l.bf16 %v3430_v61 }
  0xe0   : > { %v3069_v1 = vpack.c.bf16 %v3427_v59, %v3422_v16  ;;  %v822_v2 = vsel %vm821_vm9, %v3426_v60, %v3427_v59 }
  0xe1   : > { %v3435_v4 = vpop.permute.xlu0 %3434  ;;  %v3071_v6 = vpack.c.bf16 %v822_v2, %v802_v62  ;;  %v823_v10 = vsel %vm821_vm9, %v3431_v0, %v3432_v63 }
  0xe2   : > { %v3437_v7 = vunpack.i.h.bf16 %v3435_v4  ;;  %v3436_v8 = vunpack.i.l.bf16 %v3435_v4  ;;  %3070 = vmatprep.subr.bf16.mxu0 %v3069_v1  ;;  %v3440_v9 = vpop.permute.xlu1 %3439 }
  0xe3   : > { %3072 = vmatpush1.bf16.msra.mxu0 %v3071_v6  ;;  %v3442_v11 = vunpack.i.h.bf16 %v3440_v9  ;;  %v3441_v12 = vunpack.i.l.bf16 %v3440_v9 }
  0xe4   : > { %v3073_v5 = vpack.c.bf16 %v3437_v7, %v3432_v63  ;;  %v824_v13 = vsel %vm821_vm9, %v3436_v8, %v3437_v7 }
  0xe5   : > { %v3445_v14 = vpop.permute.xlu0 %3444  ;;  %v3075_v15 = vpack.c.bf16 %v824_v13, %v823_v10  ;;  %v844_v19 = vsel %vm843_vm11, %v3441_v12, %v3442_v11 }
  0xe6   : > { %v3447_v3 = vunpack.i.h.bf16 %v3445_v14  ;;  %v3446_v16 = vunpack.i.l.bf16 %v3445_v14  ;;  %3074 = vmatprep.subr.bf16.mxu0 %v3073_v5  ;;  %v3450_v18 = vpop.permute.xlu1 %3449 }
  0xe7   : > { %3076 = vmatpush1.bf16.msra.mxu0 %v3075_v15  ;;  %v3452_v56 = vunpack.i.h.bf16 %v3450_v18  ;;  %v3451_v57 = vunpack.i.l.bf16 %v3450_v18 }
  0xe8   : > { %v3077_v58 = vpack.c.bf16 %v3447_v3, %v3442_v11  ;;  %v845_v59 = vsel %vm843_vm11, %v3446_v16, %v3447_v3 }
  0xe9   : > { %v3455_v60 = vpop.permute.xlu0 %3454  ;;  %v3079_v61 = vpack.c.bf16 %v845_v59, %v844_v19  ;;  %v846_v1 = vsel %vm843_vm11, %v3451_v57, %v3452_v56 }
  0xea   : > { %v3457_v62 = vunpack.i.h.bf16 %v3455_v60  ;;  %v3456_v63 = vunpack.i.l.bf16 %v3455_v60  ;;  %3078 = vmatprep.subr.bf16.mxu0 %v3077_v58  ;;  %v3460_v0 = vpop.permute.xlu1 %3459 }
  0xeb   : > { %3080 = vmatpush1.bf16.msra.mxu0 %v3079_v61  ;;  %v3462_v2 = vunpack.i.h.bf16 %v3460_v0  ;;  %v3461_v4 = vunpack.i.l.bf16 %v3460_v0 }
  0xec   : > { %v3081_v6 = vpack.c.bf16 %v3457_v62, %v3452_v56  ;;  %v866_v7 = vsel %vm865_vm14, %v3456_v63, %v3457_v62 }
  0xed   : > { %v3465_v8 = vpop.permute.xlu0 %3464  ;;  %v3083_v9 = vpack.c.bf16 %v866_v7, %v846_v1  ;;  %v867_v5 = vsel %vm865_vm14, %v3461_v4, %v3462_v2 }
  0xee   : > { %v3467_v10 = vunpack.i.h.bf16 %v3465_v8  ;;  %v3466_v11 = vunpack.i.l.bf16 %v3465_v8  ;;  %3082 = vmatprep.subr.bf16.mxu0 %v3081_v6  ;;  %v3470_v12 = vpop.permute.xlu1 %3469 }
  0xef   : > { %3084 = vmatpush1.bf16.msra.mxu0 %v3083_v9  ;;  %v3472_v13 = vunpack.i.h.bf16 %v3470_v12  ;;  %v3471_v14 = vunpack.i.l.bf16 %v3470_v12 }
  0xf0   : > { %v3085_v15 = vpack.c.bf16 %v3467_v10, %v3462_v2  ;;  %v868_v3 = vsel %vm865_vm14, %v3466_v11, %v3467_v10 }
  0xf1   : > { %v3475_v16 = vpop.permute.xlu0 %3474  ;;  %v3087_v18 = vpack.c.bf16 %v868_v3, %v867_v5  ;;  %v888_v58 = vsel %vm887_vm15, %v3471_v14, %v3472_v13 }
  0xf2   : > { %v3477_v19 = vunpack.i.h.bf16 %v3475_v16  ;;  %v3476_v56 = vunpack.i.l.bf16 %v3475_v16  ;;  %3086 = vmatprep.subr.bf16.mxu0 %v3085_v15  ;;  %v3480_v57 = vpop.permute.xlu1 %3479 }
  0xf3   : > { %3088 = vmatpush1.bf16.msra.mxu0 %v3087_v18  ;;  %v3482_v59 = vunpack.i.h.bf16 %v3480_v57  ;;  %v3481_v60 = vunpack.i.l.bf16 %v3480_v57  ;;  %v919_v18 = vld [vmem:[%s4738_s1] sm:$0xff]  ;;  %v924_v57 = vld [vmem:[%s4738_s1 + $0x28] sm:$0xff] }
  0xf4   : > { %v3089_v61 = vpack.c.bf16 %v3477_v19, %v3472_v13  ;;  %v889_v62 = vsel %vm887_vm15, %v3476_v56, %v3477_v19  ;;  %v922_v19 = vld [vmem:[%s4738_s1 + $0x18] sm:$0xff]  ;;  %v921_v56 = vld [vmem:[%s4738_s1 + $0x10] sm:$0xff] }
  0xf5   : > { %v3485_v63 = vpop.permute.xlu0 %3484  ;;  %v3091_v0 = vpack.c.bf16 %v889_v62, %v888_v58  ;;  %v890_v6 = vsel %vm887_vm15, %v3481_v60, %v3482_v59  ;;  %v923_v58 = vld [vmem:[%s4738_s1 + $0x20] sm:$0xff]  ;;  %v4190_v60 = vadd.s32 240, %v3940_v17 }
  0xf6   : > { %v3487_v1 = vunpack.i.h.bf16 %v3485_v63  ;;  %v3486_v2 = vunpack.i.l.bf16 %v3485_v63  ;;  %3090 = vmatprep.subr.bf16.mxu0 %v3089_v61  ;;  %v3490_v4 = vpop.permute.xlu1 %3489  ;;  %v3701_v61 = vmov 0.0   ;;  %v4196_v63 = vadd.s32 112, %v3940_v17 }
  0xf7   : > { %3092 = vmatpush1.bf16.msra.mxu0 %v3091_v0  ;;  %v3492_v7 = vunpack.i.h.bf16 %v3490_v4  ;;  %v3491_v8 = vunpack.i.l.bf16 %v3490_v4  ;;  %v4199_v0 = vadd.s32 120, %v3940_v17  ;;  %v4216_v4 = vadd.s32 1, %v3951_v22 }
  0xf8   : > { %v3093_v9 = vpack.c.bf16 %v3487_v1, %v3482_v59  ;;  %v910_v10 = vsel %vm4774_vm2, %v3486_v2, %v3487_v1  ;;  %v4187_v59 = vadd.s32 248, %v3940_v17  ;;  %v3702_v1 = vmov 1.0  }
  0xf9   : > { %v3495_v11 = vpop.permute.xlu0 %3494  ;;  %v3095_v12 = vpack.c.bf16 %v910_v10, %v890_v6  ;;  %v911_v14 = vsel %vm4774_vm2, %v3491_v8, %v3492_v7  ;;  %vm4765_vm9 = vcmp.eq.s32.totalorder %v4196_v63, %v3951_v22  ;;  %vm4766_vm11 = vcmp.eq.s32.totalorder %v4199_v0, %v3951_v22 }
  0xfa   : > { %v3497_v5 = vunpack.i.h.bf16 %v3495_v11  ;;  %v3496_v13 = vunpack.i.l.bf16 %v3495_v11  ;;  %3094 = vmatprep.subr.bf16.mxu0 %v3093_v9  ;;  %vm591_vm6 = vcmp.eq.s32.totalorder %v4187_v59, %v3951_v22  ;;  %vm3132_vm14 = vmpackc.low %vm4766_vm11, %vm4765_vm9  ;;  %vm673_vm15 = vcmp.eq.s32.totalorder %v3946_v20, %v4216_v4 }
  0xfb   : > { %3096 = vmatpush1.bf16.msra.mxu0 %v3095_v12  ;;  %v2442_v62 = vsel %vm591_vm6, 1.0, %v3701_v61  ;;  %vm674_vm6 = vcmp.eq.s32.totalorder %v3949_v21, %v4216_v4  ;;  %vm676_vm11 = vcmp.eq.s32.totalorder %v3960_v25, %v4216_v4  ;;  %vm659_vm9 = vcmp.eq.s32.totalorder %v3963_v26, %v4216_v4 }
  0xfc   : > { %v3097_v15 = vpack.c.bf16 %v3497_v5, %v3492_v7  ;;  %v912_v3 = vsel %vm4774_vm2, %v3496_v13, %v3497_v5  ;;  %v3129_v2 = vpack.c.bf16 %v2442_v62, %v3702_v1  ;;  %vm661_vm8 = vcmp.eq.s32.totalorder %v3996_v32, %v4216_v4 }
  0xfd   : > { %v3099_v16 = vpack.c.bf16 %v912_v3, %v911_v14  ;;  %v4811_v14 = vmov 0  ;;  %vm662_vm1 = vcmp.eq.s32.totalorder %v3999_v33, %v4216_v4  ;;  %v4815_v32 = vmov 0 }
  0xfe   : > { %3098 = vmatprep.subr.bf16.mxu0 %v3097_v15  ;;  %vm686_vm4 = vcmp.eq.s32.totalorder %v4099_v50, %v4216_v4 }
  0xff   : > { %3100 = vmatpush1.bf16.msra.mxu0 %v3099_v16  ;;  %v4813_v16 = vmov 0 }
 0x102   : > { %1018 = vmatmul.mubr.f32.vlgmr.msra.gmra.mrb[0].mxu0 %v919_v18 }
 0x103   : > { %2476 = vmatprep.mubr.msk.f32.mxu0 %vm943_vm0, %v922_v19 }
 0x106   : > { %1024 = vmatmul.mubr.f32.gmra.mrb[2].mxu0 %v921_v56 }
 0x107   : > { %2477 = vmatprep.mubr.msk.f32.mxu0 %vm943_vm0, %v924_v57  ;;  %vm590_vm0 = vcmp.eq.s32.totalorder %v4190_v60, %v3951_v22  ;;  %v931_v6 = vpop.permute.xlu1 %930 }
 0x108   : > { %vm3130_vm7 = vmpackc.low %vm4767_vm3, %vm590_vm0 }
 0x109   : > { %3131 = vmatprep.subr.msk.bf16.mxu1 %vm3130_vm7, %v3129_v2  ;;  %vm3134_vm0 = vmpackc.low %vm674_vm6, %vm673_vm15  ;;  %vm657_vm15 = vcmp.eq.s32.totalorder %v3940_v17, %v4216_v4  ;;  %vm658_vm6 = vcmp.eq.s32.totalorder %v3954_v23, %v4216_v4  ;;  %vm660_vm7 = vcmp.eq.s32.totalorder %v3966_v27, %v4216_v4 }
 0x10a   : > { %1030 = vmatmul.mubr.f32.gmra.mrb[4].mxu0 %v923_v58  ;;  %3133 = vmatpush3.bf16.msk.msra.mxu1 %vm3132_vm14, %v3700_v28  ;;  %v936_v9 = vpop.permute.xlu0 %935  ;;  %vm4245_vm14 = vmpackc.low %vm658_vm6, %vm657_vm15  ;;  %vm677_vm15 = vcmp.eq.s32.totalorder %v3990_v30, %v4216_v4  ;;  %vm678_vm6 = vcmp.eq.s32.totalorder %v3993_v31, %v4216_v4 }
 0x10b   : > { %3135 = vmatprep.subr.msk.bf16.mxu1 %vm3134_vm0, %v3700_v28  ;;  %vm675_vm0 = vcmp.eq.s32.totalorder %v3957_v24, %v4216_v4  ;;  %v4812_v14 = vsel %vm4245_vm14, 4294967295, %v4811_v14  ;;  %v941_v24 = vpop.permute.xlu1 %940 }
 0x10c   : > { %vm3138_vm3 = vmpackc.low %vm676_vm11, %vm675_vm0 }
 0x10d   : > { %vm4268_vm11 = vmpackc.low %vm660_vm7, %vm659_vm9  ;;  %vm680_vm9 = vcmp.eq.s32.totalorder %v4008_v35, %v4216_v4 }
 0x10e   : > { %v4814_v16 = vsel %vm4268_vm11, 4294967295, %v4813_v16  ;;  %vm3142_vm0 = vmpackc.low %vm678_vm6, %vm677_vm15  ;;  %vm4775_vm6 = vcmp.eq.s32.totalorder %v4024_v37, %v4216_v4 }
 0x10f   : > { %vm4287_vm7 = vmpackc.low %vm662_vm1, %vm661_vm8 }
 0x110   : > { %v4816_v32 = vsel %vm4287_vm7, 4294967295, %v4815_v32 }
 0x1d5   : > { %v1019_v20 = vpop.f32.mrb[0].mxu0 }
 0x1d6   : > { %v4232_v7 = vadd.f32 %v1019_v20, %v931_v6  ;;  %v1021_v21 = vpop.f32.mrb[1].mxu0 }
 0x1d7   : > { %v1022_v8 = vadd.f32 %v1021_v21, %v931_v6 }
 0x1d8   : > { %v1036_v12 = vmax.f32 %v4232_v7, 0.0 }
 0x1d9   : > { %v1037_v10 = vmax.f32 %v1022_v8, 0.0  ;;  %v1025_v11 = vpop.f32.mrb[2].mxu0 }
 0x1da   : > { %v4243_v5 = vadd.f32 %v1025_v11, %v936_v9  ;;  %v1027_v13 = vpop.f32.mrb[3].mxu0  ;;  %v1256_v11 = vld [vmem:[%s4741_s4 + $0x10] sm:$0xff] }
 0x1db   : > { %v4249_v15 = vadd.f32 %v1027_v13, %v936_v9  ;;  %2510 = vmatprep.mubr.msk.f32.mxu1 %vm4774_vm2, %v1037_v10 }
 0x1dc   : > { %v1038_v23 = vmax.f32 %v4243_v5, 0.0  ;;  %1120 = vmatmul.mubr.f32.vlgmr.msra.gmra.mrb[0].mxu1 %v1036_v12 }
 0x1dd   : > { %v1039_v25 = vmax.f32 %v4249_v15, 0.0  ;;  %3137 = vmatpush3.bf16.msk.msra.mxu1 %vm4245_vm14, %v3700_v28  ;;  %v1031_v26 = vpop.f32.mrb[4].mxu0  ;;  %vm4776_vm14 = vcmp.eq.s32.totalorder %v4027_v38, %v4216_v4 }
 0x1de   : > { %v1032_v27 = vadd.f32 %v1031_v26, %v941_v24  ;;  %v1033_v3 = vpop.f32.mrb[5].mxu0  ;;  %3139 = vmatprep.subr.msk.bf16.mxu1 %vm3138_vm3, %v3700_v28  ;;  %vm679_vm3 = vcmp.eq.s32.totalorder %v4005_v34, %v4216_v4  ;;  %vm4311_vm8 = vmpackc.low %vm4776_vm14, %vm4775_vm6  ;;  %vm668_vm14 = vcmp.eq.s32.totalorder %v4089_v48, %v4216_v4 }
 0x1df   : > { %v1034_v30 = vadd.f32 %v1033_v3, %v941_v24  ;;  %2511 = vmatprep.mubr.msk.f32.mxu1 %vm4774_vm2, %v1039_v25  ;;  %vm3146_vm15 = vmpackc.low %vm680_vm9, %vm679_vm3  ;;  %vm665_vm3 = vcmp.eq.s32.totalorder %v4052_v42, %v4216_v4  ;;  %vm666_vm9 = vcmp.eq.s32.totalorder %v4055_v43, %v4216_v4  ;;  %v3703_v43 = vmov 0.0|0.0  }
 0x1e0   : > { %1125 = vmatmul.mubr.f32.gmra.mrb[2].mxu1 %v1038_v23  ;;  %v1040_v18 = vmax.f32 %v1032_v27, 0.0  ;;  %vm4327_vm6 = vmpackc.low %vm666_vm9, %vm665_vm3  ;;  %vm669_vm3 = vcmp.eq.s32.totalorder %v4114_v52, %v4216_v4  ;;  %vm670_vm9 = vcmp.eq.s32.totalorder %v4117_v53, %v4216_v4  ;;  %3167 = vmatprep.subr.bf16.mxu0 %v3703_v43 }
 0x1e1   : > { %v1041_v31 = vmax.f32 %v1034_v30, 0.0  ;;  %3141 = vmatpush3.bf16.msk.msra.mxu1 %vm4268_vm11, %v3700_v28  ;;  %vm681_vm11 = vcmp.eq.s32.totalorder %v4034_v39, %v4216_v4 }
 0x1e2   : > { %3143 = vmatprep.subr.msk.bf16.mxu1 %vm3142_vm0, %v3700_v28  ;;  %vm682_vm0 = vcmp.eq.s32.totalorder %v4037_v40, %v4216_v4 }
 0x1e3   : > { %2512 = vmatprep.mubr.msk.f32.mxu1 %vm4774_vm2, %v1041_v31  ;;  %vm3150_vm1 = vmpackc.low %vm682_vm0, %vm681_vm11  ;;  %vm667_vm0 = vcmp.eq.s32.totalorder %v4086_v47, %v4216_v4 }
 0x1e4   : > { %1130 = vmatmul.mubr.f32.gmra.mrb[4].mxu1 %v1040_v18 }
 0x1e5   : > { %3145 = vmatpush3.bf16.msk.msra.mxu1 %vm4287_vm7, %v3700_v28  ;;  %2545 = vmatprep.mubr.msk.f32.mxu1 %vm4774_vm2, %v1037_v10  ;;  %vm684_vm2 = vcmp.eq.s32.totalorder %v4065_v45, %v4216_v4  ;;  %vm685_vm7 = vcmp.eq.s32.totalorder %v4096_v49, %v4216_v4  ;;  %v1254_v10 = vld [vmem:[%s4741_s4] sm:$0xff] }
 0x1e6   : > { %3147 = vmatprep.subr.msk.bf16.mxu1 %vm3146_vm15, %v3700_v28  ;;  %vm683_vm15 = vcmp.eq.s32.totalorder %v4062_v44, %v4216_v4 }
 0x1e7   : > { %vm3154_vm11 = vmpackc.low %vm684_vm2, %vm683_vm15  ;;  %vm4823_vm15 = vcmp.eq.s32.totalorder %v4187_v59, %v4216_v4 }
 0x1e8   : > { %vm3158_vm2 = vmpackc.low %vm686_vm4, %vm685_vm7  ;;  %v2474_v39 = vsel %vm4823_vm15, 1.0, %v3701_v61  ;;  %vm4826_vm4 = vcmp.eq.s32.totalorder %v4190_v60, %v4216_v4  ;;  %vm4827_vm7 = vcmask 1040384  }
 0x1e9   : > { %3149 = vmatpush3.bf16.msk.msra.mxu1 %vm4311_vm8, %v3700_v28  ;;  %v3162_v42 = vpack.c.bf16 %v2474_v39, %v3702_v1 }
 0x1ea   : > { %3151 = vmatprep.subr.msk.bf16.mxu1 %vm3150_vm1, %v3700_v28  ;;  %vm4343_vm1 = vmpackc.low %vm668_vm14, %vm667_vm0  ;;  %vm4828_vm0 = vcmp.eq.s32.totalorder %v4196_v63, %v4216_v4 }
 0x1eb   : > { %vm4359_vm14 = vmpackc.low %vm670_vm9, %vm669_vm3  ;;  %vm4830_vm9 = vcmask 990208  }
 0x1ec   : > { %vm4831_vm15 = vmmov %vm4830_vm9 }
 0x1ed   : > { %3153 = vmatpush3.bf16.msk.msra.mxu1 %vm4327_vm6, %v3700_v28 }
 0x1ee   : > { %3155 = vmatprep.subr.msk.bf16.mxu1 %vm3154_vm11, %v3700_v28  ;;  %vm3163_vm11 = vmpackc.low %vm4827_vm7, %vm4826_vm4  ;;  %vm4832_vm4 = vnez %v4806_v51  ;;  %vm4833_vm7 = vnez %v4808_v54 }
 0x1f1   : > { %3157 = vmatpush3.bf16.msk.msra.mxu1 %vm4343_vm1, %v3700_v28 }
 0x1f2   : > { %3159 = vmatprep.subr.msk.bf16.mxu1 %vm3158_vm2, %v3700_v28  ;;  %vm4829_vm2 = vcmp.eq.s32.totalorder %v4199_v0, %v4216_v4 }
 0x1f3   : > { %vm3165_vm3 = vmpackc.low %vm4829_vm2, %vm4828_vm0  ;;  %vm4836_vm0 = vcmp.eq.s32.totalorder %v4196_v63, %v3951_v22  ;;  %vm4837_vm2 = vcmask 1040384  }
 0x1f5   : > { %3161 = vmatpush3.bf16.msk.msra.mxu1 %vm4359_vm14, %v3700_v28 }
 0x1f6   : > { %3164 = vmatprep.subr.msk.bf16.mxu1 %vm3163_vm11, %v3162_v42  ;;  %vm4834_vm11 = vcmp.eq.s32.totalorder %v4199_v0, %v3951_v22 }
 0x1f7   : > { %v2426_v44 = vsel %vm4834_vm11, 1.0, %v3701_v61  ;;  %vm4840_vm11 = vnez %v4816_v32 }
 0x1f8   : > { %v3207_v45 = vpack.c.bf16 %v2426_v44, %v3702_v1 }
 0x1f9   : > { %3166 = vmatpush3.bf16.msk.msra.mxu1 %vm3165_vm3, %v3700_v28  ;;  %vm3208_vm3 = vmpackc.low %vm4837_vm2, %vm4836_vm0 }
 0x1fa   : > { %3185 = vmatprep.subr.bf16.mxu1 %v3703_v43 }
 0x1fc   : > { %1203 = vmatmul.mubr.f32.vlgmr.msra.gmra.mrb[6].mxu1 %v1036_v12  ;;  %v1255_v12 = vld [vmem:[%s4741_s4 + $0x8] sm:$0xff] }
 0x1fd   : > { %2546 = vmatprep.mubr.msk.f32.mxu1 %vm4830_vm9, %v1039_v25  ;;  %3187 = vmatpush3.bf16.msk.msra.mxu1 %vm3985_vm10, %v3700_v28  ;;  %vm3704_vm9 = vmmov 0  }
 0x1fe   : > { %3188 = vmatprep.subr.bf16.mxu1 %v3703_v43  ;;  %2840 = vmatprep.mubr.msk.f32.mxu0 %vm3704_vm9, %v3701_v61 }
 0x200   : > { %1208 = vmatmul.mubr.f32.gmra.mrb[8].mxu1 %v1038_v23 }
 0x201   : > { %2547 = vmatprep.mubr.msk.f32.mxu1 %vm4831_vm15, %v1041_v31  ;;  %3190 = vmatpush3.bf16.msk.msra.mxu1 %vm4011_vm12, %v3700_v28  ;;  %vm1272_vm15 = vcmask 785408  }
 0x202   : > { %3191 = vmatprep.subr.bf16.mxu1 %v3703_v43 }
 0x204   : > { %1213 = vmatmul.mubr.f32.gmra.mrb[10].mxu1 %v1040_v18 }
 0x205   : > { %3193 = vmatpush3.bf16.msk.msra.mxu1 %vm4043_vm5, %v3700_v28  ;;  %2881 = vmatprep.mubr.msk.f32.mxu1 %vm3704_vm9, %v3701_v61 }
 0x206   : > { %3194 = vmatprep.subr.bf16.mxu1 %v3703_v43 }
 0x209   : > { %3196 = vmatpush3.bf16.msk.msra.mxu1 %vm4077_vm13, %v3700_v28  ;;  %vm4835_vm13 = vnez %v4810_v55 }
 0x20a   : > { %3197 = vmatprep.subr.bf16.mxu1 %v3703_v43 }
 0x20d   : > { %3199 = vmatpush3.bf16.msk.msra.mxu1 %vm4832_vm4, %v3700_v28  ;;  %vm4838_vm4 = vnez %v4812_v14 }
 0x20e   : > { %3200 = vmatprep.subr.bf16.mxu1 %v3703_v43 }
 0x211   : > { %3202 = vmatpush3.bf16.msk.msra.mxu1 %vm4833_vm7, %v3700_v28  ;;  %vm4839_vm7 = vnez %v4814_v16 }
 0x212   : > { %3203 = vmatprep.subr.bf16.mxu1 %v3703_v43 }
 0x215   : > { %3205 = vmatpush3.bf16.msk.msra.mxu1 %vm4835_vm13, %v3700_v28  ;;  %vm4843_vm13 = vmmov %vm4837_vm2 }
 0x216   : > { %3206 = vmatprep.subr.bf16.mxu1 %v3703_v43 }
 0x219   : > { %3209 = vmatpush3.bf16.msk.msra.mxu1 %vm3208_vm3, %v3207_v45 }
 0x21a   : > { %3235 = vmatprep.subr.bf16.mxu1 %v3703_v43 }
 0x2af   : > { %v2661_v46 = vpop.f32.mrb[0].mxu1 }
 0x2b0   : > { %v2662_v47 = vpop.f32.mrb[1].mxu1 }
 0x2b1   : > { %v2663_v48 = vadd.f32 %v2662_v47, %v2661_v46  ;;  %v1251_v47 = vld [vmem:[#allocation3] sm:$0xff] }
 0x2b3   : > { %v2664_v49 = vpop.f32.mrb[2].mxu1 }
 0x2b4   : > { %v2665_v50 = vpop.f32.mrb[3].mxu1 }
 0x2b5   : > { %v2666_v51 = vadd.f32 %v2665_v50, %v2664_v49  ;;  %v1253_v49 = vld [vmem:[#allocation3 + $0x10] sm:$0xff] }
 0x2b7   : > { %v2667_v52 = vpop.f32.mrb[4].mxu1 }
 0x2b8   : > { %v2668_v53 = vpop.f32.mrb[5].mxu1 }
 0x2b9   : > { %v2669_v54 = vadd.f32 %v2668_v53, %v2667_v52 }
 0x2cf   : > { %v2702_v55 = vpop.f32.mrb[6].mxu1 }
 0x2d0   : > { %v2703_v19 = vpop.f32.mrb[7].mxu1 }
 0x2d1   : > { %v2704_v56 = vadd.f32 %v2703_v19, %v2702_v55 }
 0x2d3   : > { %v1218_v57 = vmax.f32 %v2663_v48, %v2704_v56  ;;  %v2705_v58 = vpop.f32.mrb[8].mxu1  ;;  %v1252_v48 = vld [vmem:[#allocation3 + $0x8] sm:$0xff] }
 0x2d4   : > { %v2706_v59 = vpop.f32.mrb[9].mxu1 }
 0x2d5   : > { %v2707_v60 = vadd.f32 %v2706_v59, %v2705_v58  ;;  %1224 = vrot.lane.b32.xlu1 %v1218_v57, %s3692_s28 }
 0x2d7   : > { %v1219_v62 = vmax.f32 %v2666_v51, %v2707_v60  ;;  %v2708_v2 = vpop.f32.mrb[10].mxu1 }
 0x2d8   : > { %v2709_v6 = vpop.f32.mrb[11].mxu1 }
 0x2d9   : > { %v2710_v20 = vadd.f32 %v2709_v6, %v2708_v2  ;;  %v3505_v7 = vpack.i.bf16 %v1219_v62, %v1218_v57  ;;  %v3168_v21 = vpack.c.bf16 %v1219_v62, %v1218_v57 }
 0x2db   : > { %v1220_v8 = vmax.f32 %v2669_v54, %v2710_v20  ;;  %3506 = vrot.lane.b32.xlu1 %v3505_v7, %s3693_s20  ;;  %3169 = vmatpush3.bf16.msra.mxu0 %v3168_v21 }
 0x2dc   : > { %3170 = vmatprep.subr.bf16.mxu0 %v3703_v43 }
 0x2dd   : > { %v3500_v9 = vpack.i.bf16 %v1220_v8, %v1219_v62 }
 0x2df   : > { %3501 = vrot.lane.b32.xlu0 %v3500_v9, %s3692_s28  ;;  %1242 = vrot.lane.b32.xlu1 %v1218_v57, %s3694_s22 }
 0x2e3   : > { %1237 = vrot.lane.b32.xlu0 %v1220_v8, %s3693_s20  ;;  %1259 = vperm.xlu1 %3498, %v1254_v10  }
 0x2e7   : > { %3511 = vrot.lane.b32.xlu0 %v3500_v9, %s3694_s22  ;;  %1269 = vperm.xlu1 %3498, %v1256_v11  }
 0x2eb   : > { %1264 = vperm.xlu0 %3499, %v1255_v12  }
 0x347   : > { %v1225_v5 = vpop.permute.xlu1 %1224 }
 0x348   : > { %v3171_v13 = vpack.c.bf16 %v1225_v5, %v1220_v8 }
 0x34a   : > { %3172 = vmatpush3.bf16.msra.mxu0 %v3171_v13 }
 0x34b   : > { %3173 = vmatprep.subr.bf16.mxu0 %v3703_v43 }
 0x34d   : > { %v3507_v15 = vpop.permute.xlu1 %3506 }
 0x34e   : > { %v3509_v26 = vunpack.i.h.bf16 %v3507_v15  ;;  %v3508_v27 = vunpack.i.l.bf16 %v3507_v15 }
 0x350   : > { %v3177_v31 = vpack.c.bf16 %v3509_v26, %v3508_v27  ;;  %v1582_v26 = vld [vmem:[%s4743_s6 + $0x20] sm:$0xff]  ;;  %v1579_v27 = vld [vmem:[%s4743_s6 + $0x8] sm:$0xff] }
 0x351   : > { %v3502_v23 = vpop.permute.xlu0 %3501  ;;  %v1243_v39 = vpop.permute.xlu1 %1242 }
 0x352   : > { %v3504_v24 = vunpack.i.h.bf16 %v3502_v23  ;;  %v3503_v25 = vunpack.i.l.bf16 %v3502_v23 }
 0x354   : > { %v3174_v3 = vpack.c.bf16 %v3504_v24, %v3503_v25  ;;  %v1578_v24 = vld [vmem:[%s4743_s6] sm:$0xff]  ;;  %v1580_v25 = vld [vmem:[%s4743_s6 + $0x10] sm:$0xff] }
 0x355   : > { %v1238_v30 = vpop.permute.xlu0 %1237 }
 0x356   : > { %3175 = vmatpush3.bf16.msra.mxu0 %v3174_v3  ;;  %v3180_v42 = vpack.c.bf16 %v1243_v39, %v1238_v30  ;;  %v1581_v3 = vld [vmem:[%s4743_s6 + $0x18] sm:$0xff] }
 0x357   : > { %3176 = vmatprep.subr.bf16.mxu0 %v3703_v43 }
 0x359   : > { %v3512_v18 = vpop.permute.xlu0 %3511 }
 0x35a   : > { %3178 = vmatpush3.bf16.msra.mxu0 %v3177_v31  ;;  %v3514_v44 = vunpack.i.h.bf16 %v3512_v18  ;;  %v3513_v45 = vunpack.i.l.bf16 %v3512_v18 }
 0x35b   : > { %3179 = vmatprep.subr.bf16.mxu0 %v3703_v43 }
 0x35c   : > { %v3183_v46 = vpack.c.bf16 %v3514_v44, %v3513_v45 }
 0x35e   : > { %3181 = vmatpush3.bf16.msra.mxu0 %v3180_v42 }
 0x35f   : > { %3182 = vmatprep.subr.bf16.mxu0 %v3703_v43 }
 0x362   : > { %3184 = vmatpush3.bf16.msra.mxu0 %v3183_v46  ;;  %v1260_v35 = vpop.permute.xlu1 %1259 }
 0x363   : > { %3210 = vmatprep.subr.bf16.mxu0 %v3703_v43 }
 0x365   : > { %2841 = vmatmul.mubr.msk.f32.vlgmr.msra.gmra.mrb[6].mxu0 %vm1272_vm15, %v1251_v47 }
 0x366   : > { %2843 = vmatprep.mubr.msk.f32.mxu0 %vm3704_vm9, %v3701_v61  ;;  %3212 = vmatpush3.bf16.msk.msra.mxu0 %vm4838_vm4, %v3700_v28  ;;  %v1270_v19 = vpop.permute.xlu1 %1269 }
 0x367   : > { %3213 = vmatprep.subr.bf16.mxu0 %v3703_v43 }
 0x369   : > { %2844 = vmatmul.mubr.msk.f32.gmra.mrb[8].mxu0 %vm1272_vm15, %v1252_v48 }
 0x36a   : > { %2846 = vmatprep.mubr.msk.f32.mxu0 %vm3704_vm9, %v3701_v61  ;;  %3215 = vmatpush3.bf16.msk.msra.mxu0 %vm4839_vm7, %v3700_v28  ;;  %v1265_v53 = vpop.permute.xlu0 %1264 }
 0x36b   : > { %3216 = vmatprep.subr.bf16.mxu0 %v3703_v43 }
 0x36d   : > { %2847 = vmatmul.mubr.msk.f32.gmra.mrb[10].mxu0 %vm1272_vm15, %v1253_v49 }
 0x36e   : > { %3218 = vmatpush3.bf16.msk.msra.mxu0 %vm4840_vm11, %v3700_v28  ;;  %2922 = vmatprep.mubr.msk.f32.mxu0 %vm3704_vm9, %v3701_v61 }
 0x36f   : > { %3219 = vmatprep.subr.bf16.mxu0 %v3703_v43 }
 0x372   : > { %3221 = vmatpush3.bf16.msk.msra.mxu0 %vm4311_vm8, %v3700_v28  ;;  %vm4841_vm8 = vcmp.eq.s32.totalorder %v4199_v0, %v4216_v4 }
 0x373   : > { %3222 = vmatprep.subr.bf16.mxu0 %v3703_v43  ;;  %v2458_v33 = vsel %vm4841_vm8, 1.0, %v3701_v61 }
 0x374   : > { %v3232_v34 = vpack.c.bf16 %v2458_v33, %v3702_v1 }
 0x376   : > { %3224 = vmatpush3.bf16.msk.msra.mxu0 %vm4327_vm6, %v3700_v28  ;;  %vm4842_vm6 = vcmp.eq.s32.totalorder %v4196_v63, %v4216_v4 }
 0x377   : > { %3225 = vmatprep.subr.bf16.mxu0 %v3703_v43 }
 0x37a   : > { %3227 = vmatpush3.bf16.msk.msra.mxu0 %vm4343_vm1, %v3700_v28  ;;  %vm3233_vm1 = vmpackc.low %vm4843_vm13, %vm4842_vm6 }
 0x37b   : > { %3228 = vmatprep.subr.bf16.mxu0 %v3703_v43 }
 0x37e   : > { %3230 = vmatpush3.bf16.msk.msra.mxu0 %vm4359_vm14, %v3700_v28  ;;  %vm4844_vm14 = vcmask 990208  }
 0x37f   : > { %3231 = vmatprep.subr.bf16.mxu0 %v3703_v43  ;;  %vm4845_vm0 = vmmov %vm4844_vm14 }
 0x380   : > { %vm4846_vm2 = vmmov %vm4845_vm0 }
 0x381   : > { %vm4847_vm3 = vmmov %vm4845_vm0 }
 0x382   : > { %3234 = vmatpush3.bf16.msk.msra.mxu0 %vm3233_vm1, %v3232_v34  ;;  %vm4849_vm8 = vmmov %vm4845_vm0 }
 0x383   : > { %3253 = vmatprep.subr.bf16.mxu0 %v3703_v43  ;;  %vm4850_vm6 = vmmov %vm4845_vm0 }
 0x438   : > { %v1348_v40 = vpop.f32.mrb[6].mxu0 }
 0x439   : > { %v1349_v50 = vadd.f32 %v1348_v40, %v1260_v35  ;;  %v2842_v51 = vpop.f32.mrb[7].mxu0 }
 0x43b   : > { %v1362_v52 = vmax.f32 %v1349_v50, 0.0 }
 0x43c   : > { %v1353_v54 = vpop.f32.mrb[8].mxu0 }
 0x43d   : > { %v1354_v55 = vadd.f32 %v1353_v54, %v1265_v53  ;;  %v2845_v0 = vpop.f32.mrb[9].mxu0  ;;  %2882 = vmatmul.mubr.msk.f32.vlgmr.msra.gmra.mrb[12].mxu1 %vm4844_vm14, %v1362_v52  ;;  %2923 = vmatmul.mubr.msk.f32.vlgmr.msra.gmra.mrb[12].mxu0 %vm4845_vm0, %v1362_v52  ;;  %v1573_v52 = vld [vmem:[#allocation6] sm:$0xff]  ;;  %v1574_v53 = vld [vmem:[#allocation6 + $0x8] sm:$0xff]  ;;  %v1575_v54 = vld [vmem:[#allocation6 + $0x10] sm:$0xff]  ;;  %vm3705_vm0 = vmmov 1  }
 0x43e   : > { %2884 = vmatprep.mubr.msk.f32.mxu1 %vm3704_vm9, %v3701_v61  ;;  %2925 = vmatprep.mubr.msk.f32.mxu0 %vm3704_vm9, %v3701_v61  ;;  %v1577_v0 = vld [vmem:[#allocation6 + $0x20] sm:$0xff] }
 0x43f   : > { %v1363_v63 = vmax.f32 %v1354_v55, 0.0  ;;  %3255 = vmatpush3.bf16.msk.msra.mxu0 %vm3985_vm10, %v3700_v28  ;;  %vm4848_vm10 = vcmp.eq.s32.totalorder %v4027_v38, %v3951_v22  ;;  %v1576_v55 = vld [vmem:[#allocation6 + $0x18] sm:$0xff] }
 0x440   : > { %v1358_v56 = vpop.f32.mrb[10].mxu0  ;;  %3256 = vmatprep.subr.bf16.mxu0 %v3703_v43  ;;  %v2418_v29 = vsel %vm4848_vm10, 1.0, %v3701_v61  ;;  %vm2075_vm10 = vcmask 203776  }
 0x441   : > { %v1359_v57 = vadd.f32 %v1358_v56, %v1270_v19  ;;  %v2848_v58 = vpop.f32.mrb[11].mxu0  ;;  %2885 = vmatmul.mubr.msk.f32.gmra.mrb[14].mxu1 %vm4846_vm2, %v1363_v63  ;;  %2926 = vmatmul.mubr.msk.f32.gmra.mrb[14].mxu0 %vm4847_vm3, %v1363_v63  ;;  %v3263_v36 = vpack.c.bf16 %v2418_v29, %v3702_v1 }
 0x442   : > { %2887 = vmatprep.mubr.msk.f32.mxu1 %vm3704_vm9, %v3701_v61  ;;  %2928 = vmatprep.mubr.msk.f32.mxu0 %vm3704_vm9, %v3701_v61 }
 0x443   : > { %v1364_v59 = vmax.f32 %v1359_v57, 0.0  ;;  %3258 = vmatpush3.bf16.msk.msra.mxu0 %vm4011_vm12, %v3700_v28  ;;  %vm4851_vm12 = vcmp.eq.s32.totalorder %v4024_v37, %v3951_v22 }
 0x444   : > { %3259 = vmatprep.subr.bf16.mxu0 %v3703_v43  ;;  %vm3264_vm1 = vmpackc.low %vm4843_vm13, %vm4851_vm12  ;;  %vm2310_vm12 = vcmask 8192  }
 0x445   : > { %2888 = vmatmul.mubr.msk.f32.gmra.mrb[16].mxu1 %vm4849_vm8, %v1364_v59  ;;  %2929 = vmatmul.mubr.msk.f32.gmra.mrb[16].mxu0 %vm4850_vm6, %v1364_v59  ;;  %vm2155_vm8 = vcmask 64512   ;;  %vm2232_vm6 = vcmask 31744  }
 0x446   : > { %2955 = vmatprep.mubr.msk.f32.mxu1 %vm3704_vm9, %v3701_v61  ;;  %2986 = vmatprep.mubr.msk.f32.mxu0 %vm3704_vm9, %v3701_v61 }
 0x447   : > { %3261 = vmatpush3.bf16.msk.msra.mxu0 %vm4043_vm5, %v3700_v28  ;;  %vm1718_vm5 = vcmask 465920  }
 0x448   : > { %3262 = vmatprep.subr.bf16.mxu0 %v3703_v43 }
 0x44b   : > { %3265 = vmatpush3.bf16.msk.msra.mxu0 %vm3264_vm1, %v3263_v36 }
 0x44c   : > { %3266 = vmatprep.subr.bf16.mxu0 %v3703_v43 }
 0x510   : > { %v1443_v60 = vpop.f32.mrb[12].mxu1  ;;  %v1526_v62 = vpop.f32.mrb[12].mxu0 }
 0x511   : > { %v1540_v2 = vmax.f32 %v1443_v60, %v1526_v62  ;;  %v2883_v6 = vpop.f32.mrb[13].mxu1  ;;  %v2924_v20 = vpop.f32.mrb[13].mxu0 }
 0x513   : > { %1546 = vrot.lane.b32.xlu0 %v1540_v2, %s3692_s28 }
 0x514   : > { %v1448_v7 = vpop.f32.mrb[14].mxu1  ;;  %v1531_v41 = vpop.f32.mrb[14].mxu0 }
 0x515   : > { %v1541_v21 = vmax.f32 %v1448_v7, %v1531_v41  ;;  %v2886_v8 = vpop.f32.mrb[15].mxu1  ;;  %v2927_v9 = vpop.f32.mrb[15].mxu0 }
 0x517   : > { %v3520_v22 = vpack.i.bf16 %v1541_v21, %v1540_v2  ;;  %v3236_v10 = vpack.c.bf16 %v1541_v21, %v1540_v2 }
 0x518   : > { %v1453_v11 = vpop.f32.mrb[16].mxu1  ;;  %v1536_v12 = vpop.f32.mrb[16].mxu0 }
 0x519   : > { %v1542_v5 = vmax.f32 %v1453_v11, %v1536_v12  ;;  %v2889_v13 = vpop.f32.mrb[17].mxu1  ;;  %3521 = vrot.lane.b32.xlu0 %v3520_v22, %s3693_s20  ;;  %v2930_v15 = vpop.f32.mrb[17].mxu0  ;;  %3237 = vmatpush3.bf16.msra.mxu1 %v3236_v10 }
 0x51a   : > { %3238 = vmatprep.subr.bf16.mxu1 %v3703_v43 }
 0x51b   : > { %v3515_v23 = vpack.i.bf16 %v1542_v5, %v1541_v21 }
 0x51d   : > { %1564 = vrot.lane.b32.xlu0 %v1540_v2, %s3694_s22  ;;  %3516 = vrot.lane.b32.xlu1 %v3515_v23, %s3692_s28 }
 0x521   : > { %1585 = vperm.xlu0 %3499, %v1578_v24   ;;  %1559 = vrot.lane.b32.xlu1 %v1542_v5, %s3693_s20 }
 0x525   : > { %1595 = vperm.xlu0 %3499, %v1580_v25   ;;  %3526 = vrot.lane.b32.xlu1 %v3515_v23, %s3694_s22 }
 0x529   : > { %1605 = vperm.xlu0 %3499, %v1582_v26   ;;  %1590 = vperm.xlu1 %3498, %v1579_v27  }
 0x52d   : > { %1600 = vperm.xlu1 %3498, %v1581_v3  }
 0x585   : > { %v1547_v30 = vpop.permute.xlu0 %1546 }
 0x586   : > { %v3239_v31 = vpack.c.bf16 %v1547_v30, %v1542_v5 }
 0x588   : > { %3240 = vmatpush3.bf16.msra.mxu1 %v3239_v31 }
 0x589   : > { %3241 = vmatprep.subr.bf16.mxu1 %v3703_v43 }
 0x58b   : > { %v3522_v18 = vpop.permute.xlu0 %3521 }
 0x58c   : > { %v3524_v45 = vunpack.i.h.bf16 %v3522_v18  ;;  %v3523_v46 = vunpack.i.l.bf16 %v3522_v18 }
 0x58e   : > { %v3245_v49 = vpack.c.bf16 %v3524_v45, %v3523_v46 }
 0x58f   : > { %v3517_v39 = vpop.permute.xlu1 %3516  ;;  %v1565_v34 = vpop.permute.xlu0 %1564 }
 0x590   : > { %v3519_v42 = vunpack.i.h.bf16 %v3517_v39  ;;  %v3518_v44 = vunpack.i.l.bf16 %v3517_v39 }
 0x592   : > { %v3242_v47 = vpack.c.bf16 %v3519_v42, %v3518_v44 }
 0x593   : > { %v1560_v48 = vpop.permute.xlu1 %1559 }
 0x594   : > { %3243 = vmatpush3.bf16.msra.mxu1 %v3242_v47  ;;  %v3248_v35 = vpack.c.bf16 %v1565_v34, %v1560_v48 }
 0x595   : > { %3244 = vmatprep.subr.bf16.mxu1 %v3703_v43 }
 0x597   : > { %v3527_v33 = vpop.permute.xlu1 %3526 }
 0x598   : > { %3246 = vmatpush3.bf16.msra.mxu1 %v3245_v49  ;;  %v3529_v40 = vunpack.i.h.bf16 %v3527_v33  ;;  %v3528_v50 = vunpack.i.l.bf16 %v3527_v33 }
 0x599   : > { %3247 = vmatprep.subr.bf16.mxu1 %v3703_v43 }
 0x59a   : > { %v3251_v51 = vpack.c.bf16 %v3529_v40, %v3528_v50 }
 0x59c   : > { %3249 = vmatpush3.bf16.msra.mxu1 %v3248_v35 }
 0x59d   : > { %3250 = vmatprep.subr.bf16.mxu1 %v3703_v43 }
 0x5a0   : > { %3252 = vmatpush3.bf16.msra.mxu1 %v3251_v51  ;;  %v1586_v63 = vpop.permute.xlu0 %1585 }
 0x5a1   : > { %3279 = vmatprep.subr.bf16.mxu1 %v3703_v43 }
 0x5a3   : > { %2956 = vmatmul.mubr.msk.f32.vlgmr.msra.gmra.mrb[18].mxu1 %vm1272_vm15, %v1573_v52 }
 0x5a4   : > { %2958 = vmatprep.mubr.msk.f32.mxu1 %vm3704_vm9, %v3701_v61  ;;  %v1596_v2 = vpop.permute.xlu0 %1595 }
 0x5a7   : > { %2959 = vmatmul.mubr.msk.f32.gmra.mrb[20].mxu1 %vm1272_vm15, %v1574_v53 }
 0x5a8   : > { %2961 = vmatprep.mubr.msk.f32.mxu1 %vm3704_vm9, %v3701_v61  ;;  %v1591_v59 = vpop.permute.xlu1 %1590  ;;  %v1606_v10 = vpop.permute.xlu0 %1605 }
 0x5ab   : > { %2962 = vmatmul.mubr.msk.f32.gmra.mrb[22].mxu1 %vm1272_vm15, %v1575_v54  ;;  %v1993_v54 = vsub.s32 1, %v3940_v17 }
 0x5ac   : > { %2964 = vmatprep.mubr.msk.f32.mxu1 %vm3704_vm9, %v3701_v61  ;;  %v1601_v21 = vpop.permute.xlu1 %1600 }
 0x5af   : > { %2965 = vmatmul.mubr.msk.f32.gmra.mrb[24].mxu1 %vm1272_vm15, %v1576_v55  ;;  %v1976_v55 = vld [vmem:[#allocation2] sm:$0x1] }
 0x5b0   : > { %2967 = vmatprep.mubr.msk.f32.mxu1 %vm3704_vm9, %v3701_v61 }
 0x5b3   : > { %2968 = vmatmul.mubr.msk.f32.gmra.mrb[26].mxu1 %vm1272_vm15, %v1577_v0  ;;  %vm4852_vm15 = vcmp.eq.s32.totalorder %v4027_v38, %v4216_v4  ;;  %v4641_v0 = vld [vmem:[%s4744_s7] sm:$0x3] }
 0x5b4   : > { %v2450_v14 = vsel %vm4852_vm15, 1.0, %v3701_v61 }
 0x5b5   : > { %v3276_v16 = vpack.c.bf16 %v2450_v14, %v3702_v1 }
 0x676   : > { %v1689_v19 = vpop.f32.mrb[18].mxu1 }
 0x677   : > { %v1690_v56 = vadd.f32 %v1689_v19, %v1586_v63  ;;  %v2957_v57 = vpop.f32.mrb[19].mxu1  ;;  %v1994_v63 = vrot.slane %v4641_v0, %v1993_v54  ;;  %v2070_v19 = vld [vmem:[%s4746_s9] sm:$0xff] }
 0x678   : > { %v2072_v57 = vld [vmem:[%s4746_s9 + $0x10] sm:$0xff] }
 0x679   : > { %v1713_v58 = vmax.f32 %v1690_v56, 0.0  ;;  %v2071_v56 = vld [vmem:[%s4746_s9 + $0x8] sm:$0xff] }
 0x67a   : > { %v1694_v29 = vpop.f32.mrb[20].mxu1 }
 0x67b   : > { %v1695_v36 = vadd.f32 %v1694_v29, %v1591_v59  ;;  %v2960_v60 = vpop.f32.mrb[21].mxu1  ;;  %2987 = vmatmul.mubr.msk.f32.vlgmr.msra.gmra.mrb[18].mxu0 %vm1718_vm5, %v1713_v58  ;;  %v2073_v59 = vld [vmem:[%s4746_s9 + $0x18] sm:$0x1] }
 0x67c   : > { %3268 = vmatpush3.bf16.msk.msra.mxu0 %vm4838_vm4, %v3700_v28  ;;  %2989 = vmatprep.mubr.msk.f32.mxu0 %vm3704_vm9, %v3701_v61  ;;  %vm4853_vm4 = vcmp.eq.s32.totalorder %v4024_v37, %v4216_v4  ;;  %v3313_v29 = vpack.c.bf16 %v2073_v59, %v2072_v57 }
 0x67d   : > { %v1714_v62 = vmax.f32 %v1695_v36, 0.0  ;;  %3269 = vmatprep.subr.bf16.mxu0 %v3703_v43 }
 0x67e   : > { %v1699_v6 = vpop.f32.mrb[22].mxu1 }
 0x67f   : > { %v1700_v20 = vadd.f32 %v1699_v6, %v1596_v2  ;;  %v2963_v7 = vpop.f32.mrb[23].mxu1  ;;  %2990 = vmatmul.mubr.msk.f32.gmra.mrb[20].mxu0 %vm1718_vm5, %v1714_v62 }
 0x680   : > { %3271 = vmatpush3.bf16.msk.msra.mxu0 %vm4839_vm7, %v3700_v28  ;;  %2992 = vmatprep.mubr.msk.f32.mxu0 %vm3704_vm9, %v3701_v61  ;;  %vm4854_vm7 = vmmov %vm4843_vm13 }
 0x681   : > { %v1715_v41 = vmax.f32 %v1700_v20, 0.0  ;;  %3272 = vmatprep.subr.bf16.mxu0 %v3703_v43  ;;  %vm3277_vm14 = vmpackc.low %vm4854_vm7, %vm4853_vm4 }
 0x682   : > { %v1704_v8 = vpop.f32.mrb[24].mxu1  ;;  %vm4855_vm2 = vmmov %vm4854_vm7 }
 0x683   : > { %v1705_v9 = vadd.f32 %v1704_v8, %v1601_v21  ;;  %v2966_v22 = vpop.f32.mrb[25].mxu1  ;;  %2993 = vmatmul.mubr.msk.f32.gmra.mrb[22].mxu0 %vm1718_vm5, %v1715_v41  ;;  %vm3314_vm3 = vmpackc.low %vm4855_vm2, %vm3705_vm0 }
 0x684   : > { %3274 = vmatpush3.bf16.msk.msra.mxu0 %vm4840_vm11, %v3700_v28  ;;  %2995 = vmatprep.mubr.msk.f32.mxu0 %vm3704_vm9, %v3701_v61  ;;  %vm1996_vm11 = vcmask 261120  }
 0x685   : > { %v1716_v38 = vmax.f32 %v1705_v9, 0.0  ;;  %3275 = vmatprep.subr.bf16.mxu0 %v3703_v43  ;;  %2620 = vmatprep.mubr.msk.f32.mxu1 %vm1996_vm11, %v1994_v63 }
 0x686   : > { %v1709_v11 = vpop.f32.mrb[26].mxu1 }
 0x687   : > { %v1710_v12 = vadd.f32 %v1709_v11, %v1606_v10  ;;  %v2969_v5 = vpop.f32.mrb[27].mxu1  ;;  %2996 = vmatmul.mubr.msk.f32.gmra.mrb[24].mxu0 %vm1718_vm5, %v1716_v38 }
 0x688   : > { %2998 = vmatprep.mubr.msk.f32.mxu0 %vm3704_vm9, %v3701_v61  ;;  %3278 = vmatpush3.bf16.msk.msra.mxu0 %vm3277_vm14, %v3276_v16 }
 0x689   : > { %v1717_v28 = vmax.f32 %v1710_v12, 0.0  ;;  %3309 = vmatprep.subr.bf16.mxu0 %v3703_v43 }
 0x68b   : > { %2999 = vmatmul.mubr.msk.f32.gmra.mrb[26].mxu0 %vm1718_vm5, %v1717_v28 }
 0x68c   : > { %3017 = vmatprep.mubr.msk.f32.mxu0 %vm3704_vm9, %v3701_v61 }
 0x68f   : > { %3018 = vmatmul.mubr.msk.f32.vlgmr.msra.gmra.mrb[28].mxu0 %vm1718_vm5, %v1713_v58  ;;  %v3310_v58 = vpack.c.bf16 %v2071_v56, %v2070_v19 }
 0x690   : > { %3020 = vmatprep.mubr.msk.f32.mxu0 %vm3704_vm9, %v3701_v61 }
 0x691   : > { %3311 = vmatpush3.bf16.msra.mxu0 %v3310_v58 }
 0x692   : > { %3312 = vmatprep.subr.bf16.mxu0 %v3703_v43 }
 0x693   : > { %3021 = vmatmul.mubr.msk.f32.gmra.mrb[30].mxu0 %vm1718_vm5, %v1714_v62 }
 0x694   : > { %3023 = vmatprep.mubr.msk.f32.mxu0 %vm3704_vm9, %v3701_v61 }
 0x695   : > { %3315 = vmatpush3.bf16.msk.msra.mxu0 %vm3314_vm3, %v3313_v29 }
 0x696   : > { %3043 = vmatprep.subr.mxu0 %v3701_v61 }
 0x697   : > { %3024 = vmatmul.mubr.msk.f32.gmra.mrb[32].mxu0 %vm1718_vm5, %v1715_v41 }
 0x698   : > { %3026 = vmatprep.mubr.msk.f32.mxu0 %vm3704_vm9, %v3701_v61 }
 0x69b   : > { %3027 = vmatmul.mubr.msk.f32.gmra.mrb[34].mxu0 %vm1718_vm5, %v1716_v38 }
 0x69c   : > { %3029 = vmatprep.mubr.msk.f32.mxu0 %vm3704_vm9, %v3701_v61 }
 0x69f   : > { %3030 = vmatmul.mubr.msk.f32.gmra.mrb[36].mxu0 %vm1718_vm5, %v1717_v28 }
 0x6a0   : > { %3040 = vmatprep.mubr.msk.f32.mxu0 %vm3704_vm9, %v3701_v61 }
 0x74e   : > { %v1803_v37 = vpop.f32.mrb[18].mxu0 }
 0x74f   : > { %v2988_v1 = vpop.f32.mrb[19].mxu0 }
 0x752   : > { %v1808_v4 = vpop.f32.mrb[20].mxu0 }
 0x753   : > { %v2991_v32 = vpop.f32.mrb[21].mxu0 }
 0x756   : > { %v1813_v13 = vpop.f32.mrb[22].mxu0 }
 0x757   : > { %v2994_v15 = vpop.f32.mrb[23].mxu0 }
 0x75a   : > { %v1818_v23 = vpop.f32.mrb[24].mxu0 }
 0x75b   : > { %v2997_v24 = vpop.f32.mrb[25].mxu0 }
 0x75e   : > { %v1823_v25 = vpop.f32.mrb[26].mxu0 }
 0x75f   : > { %v3000_v26 = vpop.f32.mrb[27].mxu0 }
 0x762   : > { %v1896_v27 = vpop.f32.mrb[28].mxu0 }
 0x763   : > { %v1920_v3 = vmax.f32 %v1803_v37, %v1896_v27  ;;  %v3019_v30 = vpop.f32.mrb[29].mxu0 }
 0x765   : > { %1930 = vrot.lane.b32.xlu1 %v1920_v3, %s3692_s28 }
 0x766   : > { %v1901_v31 = vpop.f32.mrb[30].mxu0 }
 0x767   : > { %v1921_v18 = vmax.f32 %v1808_v4, %v1901_v31  ;;  %v3022_v39 = vpop.f32.mrb[31].mxu0 }
 0x769   : > { %v3280_v42 = vpack.c.bf16 %v1921_v18, %v1920_v3  ;;  %v3540_v44 = vpack.i.bf16 %v1921_v18, %v1920_v3 }
 0x76a   : > { %v1906_v45 = vpop.f32.mrb[32].mxu0 }
 0x76b   : > { %v1922_v46 = vmax.f32 %v1813_v13, %v1906_v45  ;;  %v3025_v47 = vpop.f32.mrb[33].mxu0  ;;  %3281 = vmatpush1.bf16.msra.mxu1 %v3280_v42 }
 0x76c   : > { %3282 = vmatprep.subr.bf16.mxu1 %v3703_v43 }
 0x76d   : > { %v3530_v48 = vpack.i.bf16 %v1922_v46, %v1921_v18 }
 0x76e   : > { %v1911_v49 = vpop.f32.mrb[34].mxu0 }
 0x76f   : > { %v1923_v33 = vmax.f32 %v1818_v23, %v1911_v49  ;;  %3531 = vrot.lane.b32.xlu0 %v3530_v48, %s3692_s28  ;;  %v3028_v34 = vpop.f32.mrb[35].mxu0 }
 0x771   : > { %v3283_v35 = vpack.c.bf16 %v1923_v33, %v1922_v46  ;;  %v3545_v40 = vpack.i.bf16 %v1923_v33, %v1922_v46 }
 0x772   : > { %v1916_v50 = vpop.f32.mrb[36].mxu0 }
 0x773   : > { %v1924_v51 = vmax.f32 %v1823_v25, %v1916_v50  ;;  %3541 = vrot.lane.b32.xlu0 %v3540_v44, %s3693_s20  ;;  %v3031_v52 = vpop.f32.mrb[37].mxu0  ;;  %3284 = vmatpush1.bf16.msra.mxu1 %v3283_v35  ;;  %v1984_v25 = vsub.s32 0, %v3940_v17  ;;  %v2153_v17 = vld [vmem:[%s4748_s11] sm:$0xff] }
 0x774   : > { %3285 = vmatprep.subr.bf16.mxu1 %v3703_v43 }
 0x775   : > { %v3535_v53 = vpack.i.bf16 %v1924_v51, %v1923_v33  ;;  %v1990_v27 = vrot.slane %v4641_v0, %v1984_v25 }
 0x777   : > { %1953 = vrot.lane.b32.xlu0 %v1924_v51, %s3693_s20  ;;  %3536 = vrot.lane.b32.xlu1 %v3535_v53, %s3692_s28  ;;  %s3622_s28 = scalar_lea.vmem %s3621_s24, 32 }
 0x778   : > { %p3624_p7 = scmp.lt.s32.totalorder %s3622_s28, %s3616_s17 }
 0x77a   : > { %p3625_p8 = por %p3624_p7, %p3623_p4 }
 0x77b   : > { %3551 = vrot.lane.b32.xlu0 %v3530_v48, %s3694_s22  ;;  %3546 = vrot.lane.b32.xlu1 %v3545_v40, %s3693_s20  ;;  %v2154_v48 = vld [vmem:[%s4749_s12] sm:$0x1] }
 0x77c   : > { %v2231_v40 = vld [vmem:[%s4856_s15] sm:$0x1]  ;;  %p3626_p11 = pnand %p3625_p8, %p3619_p3 }
 0x77f   : > { %1979 = vperm.xlu0 %3499, %v1976_v55   ;;  %1960 = vrot.lane.b32.xlu1 %v1920_v3, %s3694_s22 }
 0x783   : > { %3556 = vrot.lane.b32.xlu1 %v3535_v53, %s3694_s22 }
 0x7d7   : > { %v1931_v36 = vpop.permute.xlu1 %1930 }
 0x7d8   : > { %v3286_v60 = vpack.c.bf16 %v1931_v36, %v1924_v51 }
 0x7da   : > { %3287 = vmatpush1.bf16.msra.mxu1 %v3286_v60 }
 0x7db   : > { %3288 = vmatprep.subr.bf16.mxu1 %v3703_v43 }
 0x7e1   : > { %v3532_v62 = vpop.permute.xlu0 %3531 }
 0x7e2   : > { %v3534_v2 = vunpack.i.h.bf16 %v3532_v62  ;;  %v3533_v6 = vunpack.i.l.bf16 %v3532_v62 }
 0x7e4   : > { %v3289_v20 = vpack.c.bf16 %v3534_v2, %v3533_v6 }
 0x7e5   : > { %v3542_v7 = vpop.permute.xlu0 %3541 }
 0x7e6   : > { %3290 = vmatpush1.bf16.msra.mxu1 %v3289_v20  ;;  %v3544_v8 = vunpack.i.h.bf16 %v3542_v7  ;;  %v3543_v9 = vunpack.i.l.bf16 %v3542_v7 }
 0x7e7   : > { %3291 = vmatprep.subr.bf16.mxu1 %v3703_v43 }
 0x7e8   : > { %v3295_v10 = vpack.c.bf16 %v3544_v8, %v3543_v9 }
 0x7e9   : > { %v3537_v14 = vpop.permute.xlu1 %3536  ;;  %v1954_v38 = vpop.permute.xlu0 %1953 }
 0x7ea   : > { %v3539_v41 = vunpack.i.h.bf16 %v3537_v14  ;;  %v3538_v21 = vunpack.i.l.bf16 %v3537_v14 }
 0x7ec   : > { %v3292_v22 = vpack.c.bf16 %v3539_v41, %v3538_v21 }
 0x7ed   : > { %v3547_v16 = vpop.permute.xlu1 %3546  ;;  %v3552_v37 = vpop.permute.xlu0 %3551 }
 0x7ee   : > { %3293 = vmatpush1.bf16.msra.mxu1 %v3292_v22  ;;  %v3549_v11 = vunpack.i.h.bf16 %v3547_v16  ;;  %v3548_v12 = vunpack.i.l.bf16 %v3547_v16  ;;  %v3554_v1 = vunpack.i.h.bf16 %v3552_v37  ;;  %v3553_v4 = vunpack.i.l.bf16 %v3552_v37 }
 0x7ef   : > { %3294 = vmatprep.subr.bf16.mxu1 %v3703_v43 }
 0x7f0   : > { %v3298_v28 = vpack.c.bf16 %v3549_v11, %v3548_v12  ;;  %v3304_v15 = vpack.c.bf16 %v3554_v1, %v3553_v4 }
 0x7f1   : > { %v1961_v5 = vpop.permute.xlu1 %1960 }
 0x7f2   : > { %3296 = vmatpush1.bf16.msra.mxu1 %v3295_v10  ;;  %v3301_v32 = vpack.c.bf16 %v1961_v5, %v1954_v38 }
 0x7f3   : > { %3297 = vmatprep.subr.bf16.mxu1 %v3703_v43 }
 0x7f5   : > { %v3557_v13 = vpop.permute.xlu1 %3556 }
 0x7f6   : > { %3299 = vmatpush1.bf16.msra.mxu1 %v3298_v28  ;;  %v3559_v23 = vunpack.i.h.bf16 %v3557_v13  ;;  %v3558_v24 = vunpack.i.l.bf16 %v3557_v13 }
 0x7f7   : > { %3300 = vmatprep.subr.bf16.mxu1 %v3703_v43 }
 0x7f8   : > { %v3307_v26 = vpack.c.bf16 %v3559_v23, %v3558_v24 }
 0x7fa   : > { %3302 = vmatpush1.bf16.msra.mxu1 %v3301_v32 }
 0x7fb   : > { %3303 = vmatprep.subr.bf16.mxu1 %v3703_v43 }
 0x7fe   : > { %3305 = vmatpush1.bf16.msra.mxu1 %v3304_v15  ;;  %v1980_v3 = vpop.permute.xlu0 %1979 }
 0x7ff   : > { %3306 = vmatprep.subr.bf16.mxu1 %v3703_v43  ;;  %v1985_v30 = vrot.slane %v1980_v3, %v1984_v25  ;;  %v2074_v43 = vld [vmem:[%s4747_s10] sm:$0x1] }
 0x802   : > { %3308 = vmatpush1.bf16.msra.mxu1 %v3307_v26 }
 0x803   : > { %3048 = vmatprep.subr.mxu1 %v3701_v61 }
 0x805   : > { %2064 = vmatmul.mubr.f32.vlgmr.msra.gmra.mrb[28].mxu1 %v1990_v27 }
 0x806   : > { %3050 = vmatprep.mubr.msk.f32.mxu1 %vm3704_vm9, %v3701_v61 }
 0x8d8   : > { %v2065_v31 = vpop.f32.mrb[28].mxu1 }
 0x8d9   : > { %v2066_v18 = vadd.f32 %v2065_v31, %v1985_v30  ;;  %v2067_v39 = vpop.f32.mrb[29].mxu1 }
 0x8db   : > { %v2069_v42 = vmax.f32 %v2066_v18, 0.0 }
 0x8dd   : > { %3041 = vmatmul.mubr.msk.f32.vlgmr.msra.gmra.mrb[38].mxu0 %vm2075_vm10, %v2069_v42 }
 0x8de   : > { %3045 = vmatprep.mubr.msk.f32.mxu0 %vm3704_vm9, %v3701_v61  ;;  %3044 = vmatpush3.msra.mxu0 %v2153_v17  ;;  %v2230_v61 = vld [vmem:[%s4750_s13] sm:$0xf]  ;;  %vm2236_vm9 = vcmask 1043456  }
 0x8df   : > { %3049 = vmatpush3.msk.msra.mxu1 %vm2236_vm9, %v2230_v61 }
 0x9b0   : > { %v2148_v44 = vpop.f32.mrb[38].mxu0 }
 0x9b1   : > { %v2149_v45 = vadd.f32 %v2148_v44, %v2074_v43  ;;  %v3042_v46 = vpop.f32.mrb[39].mxu0 }
 0x9b3   : > { %v2152_v47 = vmax.f32 %v2149_v45, 0.0 }
 0x9b5   : > { %3046 = vmatmul.mubr.msk.f32.vlgmr.msra.gmra.mrb[40].mxu0 %vm2155_vm8, %v2152_v47 }
 0xa88   : > { %v2225_v49 = vpop.f32.mrb[40].mxu0 }
 0xa89   : > { %v2226_v33 = vadd.f32 %v2225_v49, %v2154_v48  ;;  %v3047_v34 = vpop.f32.mrb[41].mxu0 }
 0xa8b   : > { %v2229_v35 = vmax.f32 %v2226_v33, 0.0 }
 0xa8d   : > { %3051 = vmatmul.mubr.msk.f32.vlgmr.msra.gmra.mrb[30].mxu1 %vm2232_vm6, %v2229_v35 }
 0xb60   : > { %v2306_v50 = vpop.f32.mrb[30].mxu1 }
 0xb61   : > { %v2307_v51 = vadd.f32 %v2306_v50, %v2231_v40  ;;  %v3052_v52 = vpop.f32.mrb[31].mxu1 }
 0xb63   : > { %2311 = vst.msk [vmem:[%s518_s19] sm:$0x1] %vm2310_vm12, %v2307_v51 }
 0xb64   : > { %3629 = shalt.err (!%p3626_p11)
}
 0xb65   : > { %s3630_s18 = scalar_lea.hbm %s4695_s30, 16  ;;  %s3634_s15 = scalar_lea.hbm %s4857_s25, 32 }
 0xb66   : > { %p3631_p13 = scmp.ne.s32.totalorder %s4695_s30, %s3630_s18  ;;  %p3635_p6 = scmp.lt.u32.totalorder %s4695_s30, %s4857_s25 }
 0xb67   : > { %p3636_p9 = scmp.lt.u32.totalorder %s3634_s15, %s3630_s18  ;;  %p3638_p12 = scmp.lt.u32.totalorder %s3630_s18, %s4695_s30 }
 0xb68   : > { %p3632_p5 = pnand %p3631_p13, %p4858_p1 }
 0xb69   : > { %p3637_p10 = por %p3636_p9, %p3635_p6 }
 0xb6a   : > { %p3633_p0 = pneg %p3632_p5 }
 0xb6b   : > { %p3639_p2 = por %p3638_p12, %p3637_p10 }
 0xb6d   : > { %p3640_p3 = pnand %p3639_p2, %p3633_p0 }
 0xb6f   : > { %3643 = shalt.err (!%p3640_p3)
}
 0xb70   : > { %3325 = dma.vmem_to_hbm [thread:$0]  (%p4858_p1), %s4697_s26, 16, %s4695_s30, %s2313_s27  }
 0xb71 PF: > { %s4859_s22 = sld [smem:[#allocation14_spill]]  ;;  %s4860_s16 = sld [smem:[#allocation12_spill]] }
 0xb72   : > { %s4861_s17 = sld [smem:[#allocation17_spill]] }
 0xb77   : > { %p3342_p4 = scmp.ge.s32.totalorder %s4859_s22, 2  ;;  %s2337_s8 = sand.u32 1, %s4860_s16  }
 0xb78   : > { %p4862_p7 = scmp.ne.s32.totalorder %s4861_s17, 0  ;;  %s2338_s24 = scalar_lea.sflag [#allocation5], %s2337_s8 }
 0xb7a   : > { %p3335_p8 = pnand %p3342_p4, %p4862_p7 }
 0xb7c   : > { %3669 = dma.done.wait (!%p3335_p8), %s2338_s24, 16  }
 0xb7d   : > { %3671 = vsyncadd (!%p3335_p8), %s2338_s24, 4294967280  ;;  %s4863_s23 = sld [smem:[#allocation15_spill]]  ;;  %s4864_s28 = sld [smem:[#allocation13_spill]] }
 0xb7e   : > { %s4865_s22 = sld [smem:[#allocation16_spill]]  ;;  %s4866_s20 = smov %s3678_s21 }
 0xb83   : > { %p29_p11 = scmp.ge.s32.totalorder %s4863_s23, 4   ;;  %s4867_s21 = smov %s4864_s28 }
 0xb85   :  { %31 = sbr.rel (!%p29_p11) target bundleno = 8 (0x8), region = 124 }
 0xb8c   :  { %2342 = vsyncpa [#allocation4], 1 }
 0xb8d   :  { %2344 = vsyncpa [#allocation4 + $0x1], 1 }
 0xb8e   :  { %2345 = vsyncpa [#allocation7], 1 }
 0xb8f   :  { %2346 = vsyncpa [#allocation5], 1 }
 0xb90   :  { %2348 = vsyncpa [#allocation5 + $0x1], 1 }

</bundles_post_ra>
